<compile_context>
chip_gen: v7x
topology: tpu7x:2x2x1
jax: 0.10.0
libtpu: 0.0.40
codegen_flags: <defaults>
</compile_context>

<pallas_src>
import functools

import jax
import jax.numpy as jnp
from jax.experimental import pallas as pl
from jax.experimental.pallas import tpu as pltpu

IN_DIM = 28 * 28       # 784
IN_PAD = 896           # 784 padded up to a multiple of 128
H1 = 512
H2 = 256
OUT_DIM = 10
OUT_PAD = 128          # lane-dense fc3 / output width
BN_EPS = 1e-5
TB_MAX = 256           # batch tile (rows per grid step)
NEG_BIG = -1e9         # bias padding for the fake fc3 columns


def _mlp_kernel(x_ref,
                w1_ref, b1_ref,
                w2_ref, b2_ref,
                w3_ref, b3_ref,
                o_ref):
    # x_ref: (TB, IN_PAD) bf16; weights bf16; biases f32; o_ref: (TB, OUT_PAD) f32
    x = x_ref[...]

    # ---- fc1 (BN folded into w1/b1) + relu ----
    h = jnp.dot(x, w1_ref[...], preferred_element_type=jnp.float32)   # (TB, 512) f32
    h = jnp.maximum(h + b1_ref[...], 0.0)

    # ---- fc2 (BN folded) + relu ----
    h = jnp.dot(h.astype(jnp.bfloat16), w2_ref[...],
                preferred_element_type=jnp.float32)                   # (TB, 256) f32
    h = jnp.maximum(h + b2_ref[...], 0.0)

    # ---- fc3 (lane-padded to 128) + log_softmax over dim=1 ----
    logits = jnp.dot(h.astype(jnp.bfloat16), w3_ref[...],
                     preferred_element_type=jnp.float32)              # (TB, 128) f32
    logits = logits + b3_ref[...]      # padded columns sit at ~-1e9
    m = jnp.max(logits, axis=1, keepdims=True)
    z = logits - m
    lse = jnp.log(jnp.sum(jnp.exp(z), axis=1, keepdims=True))
    o_ref[...] = z - lse


def _fold_params(params):
    """Fold eval-mode BatchNorm1d into the linear weights/biases, pad, cast."""
    (w1, b1, g1, be1, rm1, rv1,
     w2, b2, g2, be2, rm2, rv2,
     w3, b3) = params

    s1 = g1 / jnp.sqrt(rv1 + BN_EPS)
    t1 = be1 - rm1 * s1
    s2 = g2 / jnp.sqrt(rv2 + BN_EPS)
    t2 = be2 - rm2 * s2

    # BN(x @ W + b) == x @ (W * s) + (b * s + t)
    w1f = jnp.pad(w1 * s1[None, :], ((0, IN_PAD - IN_DIM), (0, 0)))   # (896, 512)
    b1f = (b1 * s1 + t1).reshape(1, H1)
    w2f = w2 * s2[None, :]                                            # (512, 256)
    b2f = (b2 * s2 + t2).reshape(1, H2)

    # Lane-pad fc3 to 128 output columns (zero weights, huge-negative biases).
    w3f = jnp.pad(w3, ((0, 0), (0, OUT_PAD - OUT_DIM)))               # (256, 128)
    b3f = jnp.concatenate(
        [b3, jnp.full((OUT_PAD - OUT_DIM,), NEG_BIG, jnp.float32)]).reshape(1, OUT_PAD)

    return (w1f.astype(jnp.bfloat16), b1f,
            w2f.astype(jnp.bfloat16), b2f,
            w3f.astype(jnp.bfloat16), b3f)


@functools.partial(jax.jit, static_argnames=())
def net_forward(x_nchw, params):
    """x_nchw: (B, 1, 28, 28) float32. Returns (B, 10) log-probabilities."""
    B = x_nchw.shape[0]
    x = x_nchw.reshape(B, IN_DIM).astype(jnp.float32)        # x.view(-1, 784)
    x = jnp.pad(x, ((0, 0), (0, IN_PAD - IN_DIM)))           # K -> 896

    # Batch tiling: single full-batch block for small B, else 256-row tiles.
    if B <= TB_MAX:
        TB, Bp = B, B
    else:
        TB = TB_MAX
        Bp = ((B + TB - 1) // TB) * TB
    if Bp != B:
        x = jnp.pad(x, ((0, Bp - B), (0, 0)))
    x = x.astype(jnp.bfloat16)

    w1f, b1f, w2f, b2f, w3f, b3f = _fold_params(params)

    grid = (Bp // TB,)

    def _resident(shape):
        # Whole array as one block, same block every grid step (stays in VMEM).
        return pl.BlockSpec(shape, lambda i: tuple(0 for _ in shape))

    flops = 2 * Bp * (IN_PAD * H1 + H1 * H2 + H2 * OUT_PAD)
    bytes_accessed = (x.size * 2 + w1f.size * 2 + w2f.size * 2 + w3f.size * 2
                      + (b1f.size + b2f.size + b3f.size) * 4
                      + Bp * OUT_PAD * 4)

    out_padded = pl.pallas_call(
        _mlp_kernel,
        out_shape=jax.ShapeDtypeStruct((Bp, OUT_PAD), jnp.float32),
        grid=grid,
        in_specs=[
            pl.BlockSpec((TB, IN_PAD), lambda i: (i, 0)),   # x tile
            _resident((IN_PAD, H1)),                        # w1'
            _resident((1, H1)),                             # b1'
            _resident((H1, H2)),                            # w2'
            _resident((1, H2)),                             # b2'
            _resident((H2, OUT_PAD)),                       # w3 (padded)
            _resident((1, OUT_PAD)),                        # b3 (padded)
        ],
        out_specs=pl.BlockSpec((TB, OUT_PAD), lambda i: (i, 0)),
        compiler_params=pltpu.CompilerParams(
            dimension_semantics=("parallel",),
            vmem_limit_bytes=32 << 20,
        ),
        cost_estimate=pl.CostEstimate(
            flops=flops,
            transcendentals=Bp * (OUT_PAD + 1),
            bytes_accessed=bytes_accessed,
        ),
    )(x, w1f, b1f, w2f, b2f, w3f, b3f)

    return out_padded[:B, :OUT_DIM]


def init_params(key):
    """Deterministic parameter init mimicking PyTorch defaults."""
    ks = jax.random.split(key, 6)

    def linear_init(kw, kb, fan_in, fan_out):
        bound = 1.0 / jnp.sqrt(jnp.float32(fan_in))
        # stored as (in, out) for `x @ W`
        w = jax.random.uniform(kw, (fan_in, fan_out), jnp.float32, -bound, bound)
        b = jax.random.uniform(kb, (fan_out,), jnp.float32, -bound, bound)
        return w, b

    w1, b1 = linear_init(ks[0], ks[1], IN_DIM, H1)
    w2, b2 = linear_init(ks[2], ks[3], H1, H2)
    w3, b3 = linear_init(ks[4], ks[5], H2, OUT_DIM)

    # BatchNorm1d fresh-module state (affine params + running stats).
    g1, be1 = jnp.ones((H1,), jnp.float32), jnp.zeros((H1,), jnp.float32)
    rm1, rv1 = jnp.zeros((H1,), jnp.float32), jnp.ones((H1,), jnp.float32)
    g2, be2 = jnp.ones((H2,), jnp.float32), jnp.zeros((H2,), jnp.float32)
    rm2, rv2 = jnp.zeros((H2,), jnp.float32), jnp.ones((H2,), jnp.float32)

    return (w1, b1, g1, be1, rm1, rv1,
            w2, b2, g2, be2, rm2, rv2,
            w3, b3)


def reference_forward_f32(x_nchw, params):
    """Pure-JAX f32 reference (exact PyTorch eval-mode math)."""
    B = x_nchw.shape[0]
    x = x_nchw.reshape(B, IN_DIM).astype(jnp.float32)
    (w1, b1, g1, be1, rm1, rv1,
     w2, b2, g2, be2, rm2, rv2,
     w3, b3) = params
    h = x @ w1 + b1
    h = (h - rm1) / jnp.sqrt(rv1 + BN_EPS) * g1 + be1
    h = jnp.maximum(h, 0.0)
    h = h @ w2 + b2
    h = (h - rm2) / jnp.sqrt(rv2 + BN_EPS) * g2 + be2
    h = jnp.maximum(h, 0.0)
    logits = h @ w3 + b3
    return jax.nn.log_softmax(logits, axis=1)


def reference_forward_bf16(x_nchw, params):
    """Pure-JAX reference mirroring the kernel's bf16 matmul-operand casts."""
    B = x_nchw.shape[0]
    x = x_nchw.reshape(B, IN_DIM).astype(jnp.float32)
    x = jnp.pad(x, ((0, 0), (0, IN_PAD - IN_DIM))).astype(jnp.bfloat16)
    w1f, b1f, w2f, b2f, w3f, b3f = _fold_params(params)
    h = jnp.dot(x, w1f, preferred_element_type=jnp.float32) + b1f
    h = jnp.maximum(h, 0.0)
    h = jnp.dot(h.astype(jnp.bfloat16), w2f, preferred_element_type=jnp.float32) + b2f
    h = jnp.maximum(h, 0.0)
    logits = jnp.dot(h.astype(jnp.bfloat16), w3f, preferred_element_type=jnp.float32) + b3f
    return jax.nn.log_softmax(logits, axis=1)[:, :OUT_DIM]


if __name__ == "__main__":
    key = jax.random.PRNGKey(0)
    k_x, k_p = jax.random.split(key)

    B = 8
    x = jax.random.normal(k_x, (B, 1, 28, 28), dtype=jnp.float32)
    params = init_params(k_p)

    out = net_forward(x, params)
    out = jax.block_until_ready(out)
    assert out.shape == (B, OUT_DIM)

    # Tight check against a reference with identical bf16 operand quantization.
    ref_q = reference_forward_bf16(x, params)
    assert jnp.allclose(out, ref_q, atol=1e-3, rtol=1e-3), "mismatch vs bf16 reference"

    # Loose check against the exact f32 PyTorch-equivalent math.
    ref_f32 = reference_forward_f32(x, params)
    assert jnp.allclose(out, ref_f32, atol=5e-2, rtol=5e-2), "mismatch vs f32 reference"

    print("KERNEL_OK")
</pallas_src>

<mosaic_0001>
module attributes {stable_mosaic.version = 11 : i64} {
  func.func @_mlp_kernel(%arg0: i32, %arg1: memref<8x896xbf16, #tpu.memory_space<vmem>>, %arg2: memref<896x512xbf16, #tpu.memory_space<vmem>>, %arg3: memref<1x512xf32, #tpu.memory_space<vmem>>, %arg4: memref<512x256xbf16, #tpu.memory_space<vmem>>, %arg5: memref<1x256xf32, #tpu.memory_space<vmem>>, %arg6: memref<256x128xbf16, #tpu.memory_space<vmem>>, %arg7: memref<1x128xf32, #tpu.memory_space<vmem>>, %arg8: memref<8x128xf32, #tpu.memory_space<vmem>>) attributes {dimension_semantics = [#tpu.dimension_semantics<parallel>], iteration_bounds = array<i64: 1>, scalar_prefetch = 0 : i64, scratch_operands = 0 : i64, tpu.core_type = #tpu.core_type<tc>, window_params = [{transform_indices = @transform_0, window_bounds = array<i64: 8, 896>}, {pipeline_mode = #tpu.pipeline_mode<synchronous>, transform_indices = @transform_1, window_bounds = array<i64: 896, 512>}, {pipeline_mode = #tpu.pipeline_mode<synchronous>, transform_indices = @transform_2, window_bounds = array<i64: 1, 512>}, {pipeline_mode = #tpu.pipeline_mode<synchronous>, transform_indices = @transform_3, window_bounds = array<i64: 512, 256>}, {pipeline_mode = #tpu.pipeline_mode<synchronous>, transform_indices = @transform_4, window_bounds = array<i64: 1, 256>}, {pipeline_mode = #tpu.pipeline_mode<synchronous>, transform_indices = @transform_5, window_bounds = array<i64: 256, 128>}, {pipeline_mode = #tpu.pipeline_mode<synchronous>, transform_indices = @transform_6, window_bounds = array<i64: 1, 128>}, {transform_indices = @transform_7, window_bounds = array<i64: 8, 128>}]} {
    %c0 = arith.constant 0 : index
    %c0_0 = arith.constant 0 : index
    %0 = vector.load %arg1[%c0, %c0_0] : memref<8x896xbf16, #tpu.memory_space<vmem>>, vector<8x896xbf16>
    %c0_1 = arith.constant 0 : index
    %c0_2 = arith.constant 0 : index
    %1 = vector.load %arg2[%c0_1, %c0_2] : memref<896x512xbf16, #tpu.memory_space<vmem>>, vector<896x512xbf16>
    %cst = arith.constant dense<0.000000e+00> : vector<8x512xf32>
    %2 = tpu.matmul %0, %1, %cst {dimension_numbers = #tpu.dot_dimension_numbers<[1], [0], [0], [1], [0, 0, 1, 1], [], []>} : vector<8x896xbf16>, vector<896x512xbf16>, vector<8x512xf32> -> vector<8x512xf32>
    %c0_3 = arith.constant 0 : index
    %c0_4 = arith.constant 0 : index
    %3 = vector.load %arg3[%c0_3, %c0_4] : memref<1x512xf32, #tpu.memory_space<vmem>>, vector<1x512xf32>
    %4 = vector.broadcast %3 : vector<1x512xf32> to vector<8x512xf32>
    %5 = arith.addf %2, %4 : vector<8x512xf32>
    %cst_5 = arith.constant 0.000000e+00 : f32
    %6 = vector.broadcast %cst_5 : f32 to vector<8x512xf32>
    %7 = arith.maximumf %5, %6 : vector<8x512xf32>
    %8 = arith.truncf %7 : vector<8x512xf32> to vector<8x512xbf16>
    %c0_6 = arith.constant 0 : index
    %c0_7 = arith.constant 0 : index
    %9 = vector.load %arg4[%c0_6, %c0_7] : memref<512x256xbf16, #tpu.memory_space<vmem>>, vector<512x256xbf16>
    %cst_8 = arith.constant dense<0.000000e+00> : vector<8x256xf32>
    %10 = tpu.matmul %8, %9, %cst_8 {dimension_numbers = #tpu.dot_dimension_numbers<[1], [0], [0], [1], [0, 0, 1, 1], [], []>} : vector<8x512xbf16>, vector<512x256xbf16>, vector<8x256xf32> -> vector<8x256xf32>
    %c0_9 = arith.constant 0 : index
    %c0_10 = arith.constant 0 : index
    %11 = vector.load %arg5[%c0_9, %c0_10] : memref<1x256xf32, #tpu.memory_space<vmem>>, vector<1x256xf32>
    %12 = vector.broadcast %11 : vector<1x256xf32> to vector<8x256xf32>
    %13 = arith.addf %10, %12 : vector<8x256xf32>
    %cst_11 = arith.constant 0.000000e+00 : f32
    %14 = vector.broadcast %cst_11 : f32 to vector<8x256xf32>
    %15 = arith.maximumf %13, %14 : vector<8x256xf32>
    %16 = arith.truncf %15 : vector<8x256xf32> to vector<8x256xbf16>
    %c0_12 = arith.constant 0 : index
    %c0_13 = arith.constant 0 : index
    %17 = vector.load %arg6[%c0_12, %c0_13] : memref<256x128xbf16, #tpu.memory_space<vmem>>, vector<256x128xbf16>
    %cst_14 = arith.constant dense<0.000000e+00> : vector<8x128xf32>
    %18 = tpu.matmul %16, %17, %cst_14 {dimension_numbers = #tpu.dot_dimension_numbers<[1], [0], [0], [1], [0, 0, 1, 1], [], []>} : vector<8x256xbf16>, vector<256x128xbf16>, vector<8x128xf32> -> vector<8x128xf32>
    %c0_15 = arith.constant 0 : index
    %c0_16 = arith.constant 0 : index
    %19 = vector.load %arg7[%c0_15, %c0_16] : memref<1x128xf32, #tpu.memory_space<vmem>>, vector<1x128xf32>
    %20 = vector.broadcast %19 : vector<1x128xf32> to vector<8x128xf32>
    %21 = arith.addf %18, %20 : vector<8x128xf32>
    %cst_17 = arith.constant dense<0xFF800000> : vector<8xf32>
    %22 = vector.multi_reduction <maximumf>, %21, %cst_17 [1] : vector<8x128xf32> to vector<8xf32>
    %23 = vector.shape_cast %22 : vector<8xf32> to vector<8x1xf32>
    %24 = vector.broadcast %23 : vector<8x1xf32> to vector<8x128xf32>
    %25 = arith.subf %21, %24 : vector<8x128xf32>
    %26 = math.exp %25 : vector<8x128xf32>
    %cst_18 = arith.constant dense<0.000000e+00> : vector<8xf32>
    %27 = vector.multi_reduction <add>, %26, %cst_18 [1] : vector<8x128xf32> to vector<8xf32>
    %28 = vector.shape_cast %27 : vector<8xf32> to vector<8x1xf32>
    %29 = math.log %28 : vector<8x1xf32>
    %30 = vector.broadcast %29 : vector<8x1xf32> to vector<8x128xf32>
    %31 = arith.subf %25, %30 : vector<8x128xf32>
    %c0_19 = arith.constant 0 : index
    %c0_20 = arith.constant 0 : index
    %32 = vector.load %arg8[%c0_19, %c0_20] : memref<8x128xf32, #tpu.memory_space<vmem>>, vector<8x128xf32>
    tpu.vector_store %arg8[%c0_19, %c0_20], %31 {strides = array<i32>} : memref<8x128xf32, #tpu.memory_space<vmem>>, vector<8x128xf32>,
    return
  }
  func.func @transform_0(%arg0: i32) -> (i32, i32) {
    %c0_i32 = arith.constant 0 : i32
    %c0_i32_0 = arith.constant 0 : i32
    return %arg0, %c0_i32 : i32, i32
  }
  func.func @transform_1(%arg0: i32) -> (i32, i32) {
    %c0_i32 = arith.constant 0 : i32
    %c0_i32_0 = arith.constant 0 : i32
    %c0_i32_1 = arith.constant 0 : i32
    return %c0_i32, %c0_i32_0 : i32, i32
  }
  func.func @transform_2(%arg0: i32) -> (i32, i32) {
    %c0_i32 = arith.constant 0 : i32
    %c0_i32_0 = arith.constant 0 : i32
    %c0_i32_1 = arith.constant 0 : i32
    return %c0_i32, %c0_i32_0 : i32, i32
  }
  func.func @transform_3(%arg0: i32) -> (i32, i32) {
    %c0_i32 = arith.constant 0 : i32
    %c0_i32_0 = arith.constant 0 : i32
    %c0_i32_1 = arith.constant 0 : i32
    return %c0_i32, %c0_i32_0 : i32, i32
  }
  func.func @transform_4(%arg0: i32) -> (i32, i32) {
    %c0_i32 = arith.constant 0 : i32
    %c0_i32_0 = arith.constant 0 : i32
    %c0_i32_1 = arith.constant 0 : i32
    return %c0_i32, %c0_i32_0 : i32, i32
  }
  func.func @transform_5(%arg0: i32) -> (i32, i32) {
    %c0_i32 = arith.constant 0 : i32
    %c0_i32_0 = arith.constant 0 : i32
    %c0_i32_1 = arith.constant 0 : i32
    return %c0_i32, %c0_i32_0 : i32, i32
  }
  func.func @transform_6(%arg0: i32) -> (i32, i32) {
    %c0_i32 = arith.constant 0 : i32
    %c0_i32_0 = arith.constant 0 : i32
    %c0_i32_1 = arith.constant 0 : i32
    return %c0_i32, %c0_i32_0 : i32, i32
  }
  func.func @transform_7(%arg0: i32) -> (i32, i32) {
    %c0_i32 = arith.constant 0 : i32
    %c0_i32_0 = arith.constant 0 : i32
    return %arg0, %c0_i32 : i32, i32
  }
}

</mosaic_0001>

<bundles_post_ra>
// kernel: net_forward.1
= control target key start
LH: loop header
LB: loop body
LE: loop exit
PB: predicated region body
PF: predicated region fallthrough
CT: control target
= control target key end

     0   :  { %s4335_s0 = inlined_call_operand.vmem [shape: bf16[8,896], index: 0, kind: input, shape index: {}]   ;;  %s4336_s1 = inlined_call_operand.vmem [shape: bf16[896,512], index: 1, kind: input, shape index: {}]   ;;  %s4337_s2 = inlined_call_operand.vmem [shape: f32[1,512], index: 2, kind: input, shape index: {}]   ;;  %s4338_s3 = inlined_call_operand.vmem [shape: bf16[512,256], index: 3, kind: input, shape index: {}]   ;;  %s4339_s4 = inlined_call_operand.vmem [shape: f32[1,256], index: 4, kind: input, shape index: {}]   ;;  %s4340_s5 = inlined_call_operand.vmem [shape: bf16[256,128], index: 5, kind: input, shape index: {}]   ;;  %s4341_s6 = inlined_call_operand.vmem [shape: f32[1,128], index: 6, kind: input, shape index: {}]   ;;  %s4342_s7 = inlined_call_operand.hbm [shape: f32[8,128], index: 7, kind: output, shape index: {}]  }
   0x1   :  { %v2809_v0 = vld [vmem:[%s4336_s1 + $0x4] ss:$16 sps:$4 sm:$0xff]   ;;  %v2813_v2 = vld [vmem:[%s4336_s1] ss:$16 sps:$4 sm:$0xff]   ;;  %v29_v48 = vld [vmem:[%s4335_s0 + $0x8] sm:$0xff] }
   0x2   :  { %v2811_v1 = vld [vmem:[%s4336_s1 + $0x204] ss:$16 sps:$4 sm:$0xff]   ;;  %1423 = vmatprep.subr.bf16.mxu1 %v2809_v0  ;;  %v2814_v3 = vld [vmem:[%s4336_s1 + $0x200] ss:$16 sps:$4 sm:$0xff]   ;;  %v3486_v51 = vcombine.high %v29_v48, %v29_v48 }
   0x3   :  { %1464 = vmatprep.subr.bf16.mxu0 %v2811_v1  ;;  %v2815_v4 = vld [vmem:[%s4336_s1 + $0x24] ss:$16 sps:$4 sm:$0xff]   ;;  %1424 = vmatpush1.bf16.msra.mxu1 %v2813_v2  ;;  %v2819_v6 = vld [vmem:[%s4336_s1 + $0x20] ss:$16 sps:$4 sm:$0xff]  }
   0x4   :  { %1465 = vmatpush1.bf16.msra.mxu0 %v2814_v3  ;;  %v2817_v5 = vld [vmem:[%s4336_s1 + $0x224] ss:$16 sps:$4 sm:$0xff]   ;;  %1425 = vmatprep.subr.bf16.mxu1 %v2815_v4  ;;  %v2820_v7 = vld [vmem:[%s4336_s1 + $0x220] ss:$16 sps:$4 sm:$0xff]  }
   0x5   :  { %1466 = vmatprep.subr.bf16.mxu0 %v2817_v5  ;;  %v2821_v8 = vld [vmem:[%s4336_s1 + $0x44] ss:$16 sps:$4 sm:$0xff]   ;;  %v2825_v10 = vld [vmem:[%s4336_s1 + $0x40] ss:$16 sps:$4 sm:$0xff]   ;;  %1496 = vmatprep.mubr.bf16.mxu0 %v3486_v51  ;;  %v2914_v5 = vld [vmem:[%s4336_s1 + $0xc] ss:$16 sps:$4 sm:$0xff]  }
   0x6   :  { %v2823_v9 = vld [vmem:[%s4336_s1 + $0x244] ss:$16 sps:$4 sm:$0xff]   ;;  %v2826_v11 = vld [vmem:[%s4336_s1 + $0x240] ss:$16 sps:$4 sm:$0xff]  }
   0x7   :  { %1426 = vmatpush1.bf16.msra.mxu1 %v2819_v6  ;;  %v2827_v12 = vld [vmem:[%s4336_s1 + $0x64] ss:$16 sps:$4 sm:$0xff]   ;;  %v2831_v14 = vld [vmem:[%s4336_s1 + $0x60] ss:$16 sps:$4 sm:$0xff]  }
   0x8   :  { %1467 = vmatpush1.bf16.msra.mxu0 %v2820_v7  ;;  %1427 = vmatprep.subr.bf16.mxu1 %v2821_v8  ;;  %v2829_v13 = vld [vmem:[%s4336_s1 + $0x264] ss:$16 sps:$4 sm:$0xff]   ;;  %v2832_v15 = vld [vmem:[%s4336_s1 + $0x260] ss:$16 sps:$4 sm:$0xff]   ;;  %v3546_v7 = vcombine.low %v29_v48, %v29_v48 }
   0x9   :  { %1468 = vmatprep.subr.bf16.mxu0 %v2823_v9  ;;  %v2833_v16 = vld [vmem:[%s4336_s1 + $0x84] ss:$16 sps:$4 sm:$0xff]   ;;  %v2837_v18 = vld [vmem:[%s4336_s1 + $0x80] ss:$16 sps:$4 sm:$0xff]   ;;  %v2912_v9 = vld [vmem:[%s4336_s1 + $0x8] ss:$16 sps:$4 sm:$0xff]  }
   0xa   :  { %v2835_v17 = vld [vmem:[%s4336_s1 + $0x284] ss:$16 sps:$4 sm:$0xff]   ;;  %v2838_v19 = vld [vmem:[%s4336_s1 + $0x280] ss:$16 sps:$4 sm:$0xff]  }
   0xb   :  { %1428 = vmatpush1.bf16.msra.mxu1 %v2825_v10  ;;  %v2839_v20 = vld [vmem:[%s4336_s1 + $0xa4] ss:$16 sps:$4 sm:$0xff]   ;;  %v2843_v22 = vld [vmem:[%s4336_s1 + $0xa0] ss:$16 sps:$4 sm:$0xff]  }
   0xc   :  { %1469 = vmatpush1.bf16.msra.mxu0 %v2826_v11  ;;  %1429 = vmatprep.subr.bf16.mxu1 %v2827_v12  ;;  %v2841_v21 = vld [vmem:[%s4336_s1 + $0x2a4] ss:$16 sps:$4 sm:$0xff]   ;;  %v2844_v23 = vld [vmem:[%s4336_s1 + $0x2a0] ss:$16 sps:$4 sm:$0xff]   ;;  %v2920_v11 = vld [vmem:[%s4336_s1 + $0x2c] ss:$16 sps:$4 sm:$0xff]  }
   0xd   :  { %1470 = vmatprep.subr.bf16.mxu0 %v2829_v13  ;;  %v2845_v24 = vld [vmem:[%s4336_s1 + $0xc4] ss:$16 sps:$4 sm:$0xff]   ;;  %v2849_v26 = vld [vmem:[%s4336_s1 + $0xc0] ss:$16 sps:$4 sm:$0xff]   ;;  %v2918_v13 = vld [vmem:[%s4336_s1 + $0x28] ss:$16 sps:$4 sm:$0xff]  }
   0xe   :  { %v2847_v25 = vld [vmem:[%s4336_s1 + $0x2c4] ss:$16 sps:$4 sm:$0xff]   ;;  %v2850_v27 = vld [vmem:[%s4336_s1 + $0x2c0] ss:$16 sps:$4 sm:$0xff]  }
   0xf   :  { %1430 = vmatpush1.bf16.msra.mxu1 %v2831_v14  ;;  %v2851_v28 = vld [vmem:[%s4336_s1 + $0xe4] ss:$16 sps:$4 sm:$0xff]   ;;  %v2855_v30 = vld [vmem:[%s4336_s1 + $0xe0] ss:$16 sps:$4 sm:$0xff]  }
  0x10   :  { %1471 = vmatpush1.bf16.msra.mxu0 %v2832_v15  ;;  %1431 = vmatprep.subr.bf16.mxu1 %v2833_v16  ;;  %v2853_v29 = vld [vmem:[%s4336_s1 + $0x2e4] ss:$16 sps:$4 sm:$0xff]   ;;  %v2856_v31 = vld [vmem:[%s4336_s1 + $0x2e0] ss:$16 sps:$4 sm:$0xff]   ;;  %v2926_v15 = vld [vmem:[%s4336_s1 + $0x4c] ss:$16 sps:$4 sm:$0xff]  }
  0x11   :  { %1472 = vmatprep.subr.bf16.mxu0 %v2835_v17  ;;  %v2857_v32 = vld [vmem:[%s4336_s1 + $0x104] ss:$16 sps:$4 sm:$0xff]   ;;  %v2861_v34 = vld [vmem:[%s4336_s1 + $0x100] ss:$16 sps:$4 sm:$0xff]   ;;  %v2924_v17 = vld [vmem:[%s4336_s1 + $0x48] ss:$16 sps:$4 sm:$0xff]  }
  0x12   :  { %v2859_v33 = vld [vmem:[%s4336_s1 + $0x304] ss:$16 sps:$4 sm:$0xff]   ;;  %v2862_v35 = vld [vmem:[%s4336_s1 + $0x300] ss:$16 sps:$4 sm:$0xff]  }
  0x13   :  { %1432 = vmatpush1.bf16.msra.mxu1 %v2837_v18  ;;  %v2863_v36 = vld [vmem:[%s4336_s1 + $0x124] ss:$16 sps:$4 sm:$0xff]   ;;  %v2867_v38 = vld [vmem:[%s4336_s1 + $0x120] ss:$16 sps:$4 sm:$0xff]  }
  0x14   :  { %1473 = vmatpush1.bf16.msra.mxu0 %v2838_v19  ;;  %1433 = vmatprep.subr.bf16.mxu1 %v2839_v20  ;;  %v2865_v37 = vld [vmem:[%s4336_s1 + $0x324] ss:$16 sps:$4 sm:$0xff]   ;;  %v2868_v39 = vld [vmem:[%s4336_s1 + $0x320] ss:$16 sps:$4 sm:$0xff]   ;;  %v2932_v19 = vld [vmem:[%s4336_s1 + $0x6c] ss:$16 sps:$4 sm:$0xff]  }
  0x15   :  { %1474 = vmatprep.subr.bf16.mxu0 %v2841_v21  ;;  %v2869_v40 = vld [vmem:[%s4336_s1 + $0x144] ss:$16 sps:$4 sm:$0xff]   ;;  %v2873_v42 = vld [vmem:[%s4336_s1 + $0x140] ss:$16 sps:$4 sm:$0xff]   ;;  %v2930_v21 = vld [vmem:[%s4336_s1 + $0x68] ss:$16 sps:$4 sm:$0xff]  }
  0x16   :  { %v2871_v41 = vld [vmem:[%s4336_s1 + $0x344] ss:$16 sps:$4 sm:$0xff]   ;;  %v2874_v43 = vld [vmem:[%s4336_s1 + $0x340] ss:$16 sps:$4 sm:$0xff]  }
  0x17   :  { %1434 = vmatpush1.bf16.msra.mxu1 %v2843_v22  ;;  %v2875_v44 = vld [vmem:[%s4336_s1 + $0x164] ss:$16 sps:$4 sm:$0xff]   ;;  %v2879_v49 = vld [vmem:[%s4336_s1 + $0x160] ss:$16 sps:$4 sm:$0xff]  }
  0x18   :  { %1475 = vmatpush1.bf16.msra.mxu0 %v2844_v23  ;;  %1435 = vmatprep.subr.bf16.mxu1 %v2845_v24  ;;  %v2877_v45 = vld [vmem:[%s4336_s1 + $0x364] ss:$16 sps:$4 sm:$0xff]   ;;  %v2880_v50 = vld [vmem:[%s4336_s1 + $0x360] ss:$16 sps:$4 sm:$0xff]   ;;  %v2938_v23 = vld [vmem:[%s4336_s1 + $0x8c] ss:$16 sps:$4 sm:$0xff]  }
  0x19   :  { %1476 = vmatprep.subr.bf16.mxu0 %v2847_v25  ;;  %v28_v46 = vld [vmem:[%s4335_s0] sm:$0xff]  ;;  %v2936_v25 = vld [vmem:[%s4336_s1 + $0x88] ss:$16 sps:$4 sm:$0xff]  }
  0x1a   :  { %v3475_v47 = vcombine.high %v28_v46, %v28_v46  ;;  %v2881_v52 = vld [vmem:[%s4336_s1 + $0x184] ss:$16 sps:$4 sm:$0xff]   ;;  %v2885_v54 = vld [vmem:[%s4336_s1 + $0x180] ss:$16 sps:$4 sm:$0xff]   ;;  %v3544_v6 = vcombine.low %v28_v46, %v28_v46 }
  0x1b   :  { %1436 = vmatpush1.bf16.msra.mxu1 %v2849_v26  ;;  %v2883_v53 = vld [vmem:[%s4336_s1 + $0x384] ss:$16 sps:$4 sm:$0xff]   ;;  %v2886_v55 = vld [vmem:[%s4336_s1 + $0x380] ss:$16 sps:$4 sm:$0xff]  }
  0x1c   :  { %1477 = vmatpush1.bf16.msra.mxu0 %v2850_v27  ;;  %1437 = vmatprep.subr.bf16.mxu1 %v2851_v28  ;;  %v2887_v56 = vld [vmem:[%s4336_s1 + $0x1a4] ss:$16 sps:$4 sm:$0xff]   ;;  %v2891_v58 = vld [vmem:[%s4336_s1 + $0x1a0] ss:$16 sps:$4 sm:$0xff]   ;;  %v2944_v27 = vld [vmem:[%s4336_s1 + $0xac] ss:$16 sps:$4 sm:$0xff]  }
  0x1d   :  { %1478 = vmatprep.subr.bf16.mxu0 %v2853_v29  ;;  %1455 = vmatprep.mubr.bf16.mxu1 %v3475_v47  ;;  %v2889_v57 = vld [vmem:[%s4336_s1 + $0x3a4] ss:$16 sps:$4 sm:$0xff]   ;;  %v2892_v59 = vld [vmem:[%s4336_s1 + $0x3a0] ss:$16 sps:$4 sm:$0xff]   ;;  %v2942_v29 = vld [vmem:[%s4336_s1 + $0xa8] ss:$16 sps:$4 sm:$0xff]  }
  0x1e   :  { %v2893_v60 = vld [vmem:[%s4336_s1 + $0x1c4] ss:$16 sps:$4 sm:$0xff]   ;;  %v2897_v62 = vld [vmem:[%s4336_s1 + $0x1c0] ss:$16 sps:$4 sm:$0xff]  }
  0x1f   :  { %1438 = vmatpush1.bf16.msra.mxu1 %v2855_v30  ;;  %v2895_v61 = vld [vmem:[%s4336_s1 + $0x3c4] ss:$16 sps:$4 sm:$0xff]   ;;  %v2898_v63 = vld [vmem:[%s4336_s1 + $0x3c0] ss:$16 sps:$4 sm:$0xff]  }
  0x20   :  { %1479 = vmatpush1.bf16.msra.mxu0 %v2856_v31  ;;  %1439 = vmatprep.subr.bf16.mxu1 %v2857_v32  ;;  %v2899_v0 = vld [vmem:[%s4336_s1 + $0x1e4] ss:$16 sps:$4 sm:$0xff]   ;;  %v2903_v2 = vld [vmem:[%s4336_s1 + $0x1e0] ss:$16 sps:$4 sm:$0xff]   ;;  %v2950_v31 = vld [vmem:[%s4336_s1 + $0xcc] ss:$16 sps:$4 sm:$0xff]  }
  0x21   :  { %1480 = vmatprep.subr.bf16.mxu0 %v2859_v33  ;;  %v2901_v1 = vld [vmem:[%s4336_s1 + $0x3e4] ss:$16 sps:$4 sm:$0xff]   ;;  %v2904_v3 = vld [vmem:[%s4336_s1 + $0x3e0] ss:$16 sps:$4 sm:$0xff]  }
  0x22   :  { %v2911_v4 = vld [vmem:[%s4336_s1 + $0x404] ss:$16 sps:$4 sm:$0xff]   ;;  %v2909_v8 = vld [vmem:[%s4336_s1 + $0x400] ss:$16 sps:$4 sm:$0xff]  }
  0x23   :  { %1440 = vmatpush1.bf16.msra.mxu1 %v2861_v34  ;;  %v2917_v10 = vld [vmem:[%s4336_s1 + $0x424] ss:$16 sps:$4 sm:$0xff]   ;;  %v2915_v12 = vld [vmem:[%s4336_s1 + $0x420] ss:$16 sps:$4 sm:$0xff]  }
  0x24   :  { %1481 = vmatpush1.bf16.msra.mxu0 %v2862_v35  ;;  %1441 = vmatprep.subr.bf16.mxu1 %v2863_v36  ;;  %v2923_v14 = vld [vmem:[%s4336_s1 + $0x444] ss:$16 sps:$4 sm:$0xff]   ;;  %v2921_v16 = vld [vmem:[%s4336_s1 + $0x440] ss:$16 sps:$4 sm:$0xff]   ;;  %v2948_v35 = vld [vmem:[%s4336_s1 + $0xc8] ss:$16 sps:$4 sm:$0xff]  }
  0x25   :  { %1482 = vmatprep.subr.bf16.mxu0 %v2865_v37  ;;  %v2929_v18 = vld [vmem:[%s4336_s1 + $0x464] ss:$16 sps:$4 sm:$0xff]   ;;  %v2927_v20 = vld [vmem:[%s4336_s1 + $0x460] ss:$16 sps:$4 sm:$0xff]   ;;  %v2956_v37 = vld [vmem:[%s4336_s1 + $0xec] ss:$16 sps:$4 sm:$0xff]  }
  0x26   :  { %v2935_v22 = vld [vmem:[%s4336_s1 + $0x484] ss:$16 sps:$4 sm:$0xff]   ;;  %v2933_v24 = vld [vmem:[%s4336_s1 + $0x480] ss:$16 sps:$4 sm:$0xff]  }
  0x27   :  { %1442 = vmatpush1.bf16.msra.mxu1 %v2867_v38  ;;  %v2941_v26 = vld [vmem:[%s4336_s1 + $0x4a4] ss:$16 sps:$4 sm:$0xff]   ;;  %v2939_v28 = vld [vmem:[%s4336_s1 + $0x4a0] ss:$16 sps:$4 sm:$0xff]  }
  0x28   :  { %1483 = vmatpush1.bf16.msra.mxu0 %v2868_v39  ;;  %1443 = vmatprep.subr.bf16.mxu1 %v2869_v40  ;;  %v2947_v30 = vld [vmem:[%s4336_s1 + $0x4c4] ss:$16 sps:$4 sm:$0xff]   ;;  %v2945_v33 = vld [vmem:[%s4336_s1 + $0x4c0] ss:$16 sps:$4 sm:$0xff]   ;;  %v2954_v39 = vld [vmem:[%s4336_s1 + $0xe8] ss:$16 sps:$4 sm:$0xff]  }
  0x29   :  { %1484 = vmatprep.subr.bf16.mxu0 %v2871_v41  ;;  %v3626_v32 = vld [vmem:[%s4335_s0 + $0x10] sm:$0xff]  ;;  %v2962_v41 = vld [vmem:[%s4336_s1 + $0x10c] ss:$16 sps:$4 sm:$0xff]  }
  0x2a   :  { %v3633_v34 = vcombine.high %v3626_v32, %v3626_v32  ;;  %v2953_v36 = vld [vmem:[%s4336_s1 + $0x4e4] ss:$16 sps:$4 sm:$0xff]   ;;  %v2951_v38 = vld [vmem:[%s4336_s1 + $0x4e0] ss:$16 sps:$4 sm:$0xff]  }
  0x2b   :  { %1444 = vmatpush1.bf16.msra.mxu1 %v2873_v42  ;;  %v2959_v40 = vld [vmem:[%s4336_s1 + $0x504] ss:$16 sps:$4 sm:$0xff]   ;;  %v2957_v42 = vld [vmem:[%s4336_s1 + $0x500] ss:$16 sps:$4 sm:$0xff]  }
  0x2c   :  { %1485 = vmatpush1.bf16.msra.mxu0 %v2874_v43  ;;  %1445 = vmatprep.subr.bf16.mxu1 %v2875_v44  ;;  %v2960_v43 = vld [vmem:[%s4336_s1 + $0x108] ss:$16 sps:$4 sm:$0xff]   ;;  %v2965_v44 = vld [vmem:[%s4336_s1 + $0x524] ss:$16 sps:$4 sm:$0xff]   ;;  %v2963_v46 = vld [vmem:[%s4336_s1 + $0x520] ss:$16 sps:$4 sm:$0xff]  }
  0x2d   :  { %1486 = vmatprep.subr.bf16.mxu0 %v2877_v45  ;;  %v2968_v45 = vld [vmem:[%s4336_s1 + $0x12c] ss:$16 sps:$4 sm:$0xff]   ;;  %v2971_v48 = vld [vmem:[%s4336_s1 + $0x544] ss:$16 sps:$4 sm:$0xff]  }
  0x2f   :  { %1446 = vmatpush1.bf16.msra.mxu1 %v2879_v49  ;;  %v2974_v49 = vld [vmem:[%s4336_s1 + $0x14c] ss:$16 sps:$4 sm:$0xff]  }
  0x30   :  { %1487 = vmatpush1.bf16.msra.mxu0 %v2880_v50  ;;  %1447 = vmatprep.subr.bf16.mxu1 %v2881_v52  ;;  %v2969_v50 = vld [vmem:[%s4336_s1 + $0x540] ss:$16 sps:$4 sm:$0xff]   ;;  %v2972_v52 = vld [vmem:[%s4336_s1 + $0x148] ss:$16 sps:$4 sm:$0xff]  }
  0x31   :  { %1488 = vmatprep.subr.bf16.mxu0 %v2883_v53  ;;  %v2977_v53 = vld [vmem:[%s4336_s1 + $0x564] ss:$16 sps:$4 sm:$0xff]  }
  0x33   :  { %1448 = vmatpush1.bf16.msra.mxu1 %v2885_v54  ;;  %v2980_v54 = vld [vmem:[%s4336_s1 + $0x16c] ss:$16 sps:$4 sm:$0xff]  }
  0x34   :  { %1489 = vmatpush1.bf16.msra.mxu0 %v2886_v55  ;;  %1449 = vmatprep.subr.bf16.mxu1 %v2887_v56  ;;  %v2975_v55 = vld [vmem:[%s4336_s1 + $0x560] ss:$16 sps:$4 sm:$0xff]   ;;  %v2978_v56 = vld [vmem:[%s4336_s1 + $0x168] ss:$16 sps:$4 sm:$0xff]  }
  0x35   :  { %1490 = vmatprep.subr.bf16.mxu0 %v2889_v57  ;;  %v2983_v57 = vld [vmem:[%s4336_s1 + $0x584] ss:$16 sps:$4 sm:$0xff]  }
  0x37   :  { %1450 = vmatpush1.bf16.msra.mxu1 %v2891_v58  ;;  %v2986_v58 = vld [vmem:[%s4336_s1 + $0x18c] ss:$16 sps:$4 sm:$0xff]  }
  0x38   :  { %1491 = vmatpush1.bf16.msra.mxu0 %v2892_v59  ;;  %1451 = vmatprep.subr.bf16.mxu1 %v2893_v60  ;;  %v2981_v59 = vld [vmem:[%s4336_s1 + $0x580] ss:$16 sps:$4 sm:$0xff]   ;;  %v2984_v60 = vld [vmem:[%s4336_s1 + $0x188] ss:$16 sps:$4 sm:$0xff]  }
  0x39   :  { %1492 = vmatprep.subr.bf16.mxu0 %v2895_v61  ;;  %v2989_v61 = vld [vmem:[%s4336_s1 + $0x5a4] ss:$16 sps:$4 sm:$0xff]  }
  0x3b   :  { %1452 = vmatpush1.bf16.msra.mxu1 %v2897_v62  ;;  %v2992_v62 = vld [vmem:[%s4336_s1 + $0x1ac] ss:$16 sps:$4 sm:$0xff]  }
  0x3c   :  { %1493 = vmatpush1.bf16.msra.mxu0 %v2898_v63  ;;  %1453 = vmatprep.subr.bf16.mxu1 %v2899_v0  ;;  %v2987_v63 = vld [vmem:[%s4336_s1 + $0x5a0] ss:$16 sps:$4 sm:$0xff]   ;;  %v2990_v0 = vld [vmem:[%s4336_s1 + $0x1a8] ss:$16 sps:$4 sm:$0xff]  }
  0x3d   :  { %1494 = vmatprep.subr.bf16.mxu0 %v2901_v1  ;;  %v2995_v1 = vld [vmem:[%s4336_s1 + $0x5c4] ss:$16 sps:$4 sm:$0xff]  }
  0x3f   :  { %1454 = vmatpush1.bf16.msra.mxu1 %v2903_v2  ;;  %v2998_v2 = vld [vmem:[%s4336_s1 + $0x1cc] ss:$16 sps:$4 sm:$0xff]  }
  0x40   :  { %1495 = vmatpush1.bf16.msra.mxu0 %v2904_v3  ;;  %1587 = vmatprep.subr.bf16.mxu1 %v2914_v5  ;;  %v2993_v3 = vld [vmem:[%s4336_s1 + $0x5c0] ss:$16 sps:$4 sm:$0xff]   ;;  %v3001_v5 = vld [vmem:[%s4336_s1 + $0x5e4] ss:$16 sps:$4 sm:$0xff]  }
  0x41   :  { %1505 = vmatprep.subr.bf16.mxu0 %v2911_v4  ;;  %v2996_v4 = vld [vmem:[%s4336_s1 + $0x1c8] ss:$16 sps:$4 sm:$0xff]  }
  0x42   :  { %1456 = vmatmul.mubr.bf16.vlgmr.msra.gmra.mrb[0].mxu1 %v3544_v6 }
  0x43   :  { %1497 = vmatmul.mubr.bf16.vlgmr.msra.gmra.mrb[0].mxu0 %v3546_v7  ;;  %1588 = vmatpush1.bf16.msra.mxu1 %v2912_v9  ;;  %v2999_v9 = vld [vmem:[%s4336_s1 + $0x5e0] ss:$16 sps:$4 sm:$0xff]  }
  0x44   :  { %1506 = vmatpush1.bf16.msra.mxu0 %v2909_v8  ;;  %1589 = vmatprep.subr.bf16.mxu1 %v2920_v11  ;;  %v3004_v8 = vld [vmem:[%s4336_s1 + $0x1ec] ss:$16 sps:$4 sm:$0xff]   ;;  %v3009_v11 = vld [vmem:[%s4336_s1 + $0x604] ss:$16 sps:$4 sm:$0xff]  }
  0x45   :  { %1507 = vmatprep.subr.bf16.mxu0 %v2917_v10  ;;  %1619 = vmatprep.mubr.bf16.mxu1 %v3475_v47  ;;  %v2966_v47 = vld [vmem:[%s4336_s1 + $0x128] ss:$16 sps:$4 sm:$0xff]  }
  0x46   :  { %1537 = vmatprep.mubr.bf16.mxu0 %v3633_v34  ;;  %v3002_v10 = vld [vmem:[%s4336_s1 + $0x1e8] ss:$16 sps:$4 sm:$0xff]  }
  0x47   :  { %1590 = vmatpush1.bf16.msra.mxu1 %v2918_v13  ;;  %v3755_v13 = vcombine.low %v3626_v32, %v3626_v32  ;;  %v3042_v32 = vld [vmem:[%s4336_s1 + $0x2ac] ss:$16 sps:$4 sm:$0xff]  }
  0x48   :  { %1508 = vmatpush1.bf16.msra.mxu0 %v2915_v12  ;;  %1591 = vmatprep.subr.bf16.mxu1 %v2926_v15  ;;  %v3012_v12 = vld [vmem:[%s4336_s1 + $0x20c] ss:$16 sps:$4 sm:$0xff]   ;;  %v3010_v15 = vld [vmem:[%s4336_s1 + $0x208] ss:$16 sps:$4 sm:$0xff]  }
  0x49   :  { %1509 = vmatprep.subr.bf16.mxu0 %v2923_v14  ;;  %v3007_v14 = vld [vmem:[%s4336_s1 + $0x600] ss:$16 sps:$4 sm:$0xff]  }
  0x4b   :  { %1592 = vmatpush1.bf16.msra.mxu1 %v2924_v17  ;;  %v3018_v17 = vld [vmem:[%s4336_s1 + $0x22c] ss:$16 sps:$4 sm:$0xff]  }
  0x4c   :  { %1510 = vmatpush1.bf16.msra.mxu0 %v2921_v16  ;;  %1593 = vmatprep.subr.bf16.mxu1 %v2932_v19  ;;  %v3015_v16 = vld [vmem:[%s4336_s1 + $0x624] ss:$16 sps:$4 sm:$0xff]   ;;  %v3016_v19 = vld [vmem:[%s4336_s1 + $0x228] ss:$16 sps:$4 sm:$0xff]  }
  0x4d   :  { %1511 = vmatprep.subr.bf16.mxu0 %v2929_v18  ;;  %v3013_v18 = vld [vmem:[%s4336_s1 + $0x620] ss:$16 sps:$4 sm:$0xff]  }
  0x4f   :  { %1594 = vmatpush1.bf16.msra.mxu1 %v2930_v21  ;;  %v3292_v21 = vmov 0  }
  0x50   :  { %1512 = vmatpush1.bf16.msra.mxu0 %v2927_v20  ;;  %1595 = vmatprep.subr.bf16.mxu1 %v2938_v23  ;;  %v3021_v20 = vld [vmem:[%s4336_s1 + $0x644] ss:$16 sps:$4 sm:$0xff]   ;;  %v3022_v23 = vld [vmem:[%s4336_s1 + $0x248] ss:$16 sps:$4 sm:$0xff]  }
  0x51   :  { %1513 = vmatprep.subr.bf16.mxu0 %v2935_v22  ;;  %v3019_v22 = vld [vmem:[%s4336_s1 + $0x640] ss:$16 sps:$4 sm:$0xff]  }
  0x53   :  { %1596 = vmatpush1.bf16.msra.mxu1 %v2936_v25  ;;  %v3025_v25 = vld [vmem:[%s4336_s1 + $0x660] ss:$16 sps:$4 sm:$0xff]  }
  0x54   :  { %1514 = vmatpush1.bf16.msra.mxu0 %v2933_v24  ;;  %1597 = vmatprep.subr.bf16.mxu1 %v2944_v27  ;;  %v3027_v24 = vld [vmem:[%s4336_s1 + $0x664] ss:$16 sps:$4 sm:$0xff]  }
  0x55   :  { %1515 = vmatprep.subr.bf16.mxu0 %v2941_v26  ;;  %v3028_v26 = vld [vmem:[%s4336_s1 + $0x268] ss:$16 sps:$4 sm:$0xff]   ;;  %v3033_v27 = vld [vmem:[%s4336_s1 + $0x684] ss:$16 sps:$4 sm:$0xff]  }
  0x57   :  { %1598 = vmatpush1.bf16.msra.mxu1 %v2942_v29  ;;  %v3031_v29 = vld [vmem:[%s4336_s1 + $0x680] ss:$16 sps:$4 sm:$0xff]  }
  0x58   :  { %1516 = vmatpush1.bf16.msra.mxu0 %v2939_v28  ;;  %1599 = vmatprep.subr.bf16.mxu1 %v2950_v31  ;;  %v3036_v28 = vld [vmem:[%s4336_s1 + $0x28c] ss:$16 sps:$4 sm:$0xff]   ;;  %v3039_v31 = vld [vmem:[%s4336_s1 + $0x6a4] ss:$16 sps:$4 sm:$0xff]  }
  0x59   :  { %1517 = vmatprep.subr.bf16.mxu0 %v2947_v30  ;;  %v3034_v30 = vld [vmem:[%s4336_s1 + $0x288] ss:$16 sps:$4 sm:$0xff]  }
  0x5b   :  { %1600 = vmatpush1.bf16.msra.mxu1 %v2948_v35  ;;  %v3040_v35 = vld [vmem:[%s4336_s1 + $0x2a8] ss:$16 sps:$4 sm:$0xff]  }
  0x5c   :  { %1518 = vmatpush1.bf16.msra.mxu0 %v2945_v33  ;;  %1601 = vmatprep.subr.bf16.mxu1 %v2956_v37  ;;  %v3037_v33 = vld [vmem:[%s4336_s1 + $0x6a0] ss:$16 sps:$4 sm:$0xff]   ;;  %v3048_v37 = vld [vmem:[%s4336_s1 + $0x2cc] ss:$16 sps:$4 sm:$0xff]  }
  0x5d   :  { %1519 = vmatprep.subr.bf16.mxu0 %v2953_v36  ;;  %v3045_v36 = vld [vmem:[%s4336_s1 + $0x6c4] ss:$16 sps:$4 sm:$0xff]  }
  0x5f   :  { %1602 = vmatpush1.bf16.msra.mxu1 %v2954_v39  ;;  %v3046_v39 = vld [vmem:[%s4336_s1 + $0x2c8] ss:$16 sps:$4 sm:$0xff]  }
  0x60   :  { %1520 = vmatpush1.bf16.msra.mxu0 %v2951_v38  ;;  %1603 = vmatprep.subr.bf16.mxu1 %v2962_v41  ;;  %v3043_v38 = vld [vmem:[%s4336_s1 + $0x6c0] ss:$16 sps:$4 sm:$0xff]   ;;  %v3054_v41 = vld [vmem:[%s4336_s1 + $0x2ec] ss:$16 sps:$4 sm:$0xff]  }
  0x61   :  { %1521 = vmatprep.subr.bf16.mxu0 %v2959_v40  ;;  %v3051_v40 = vld [vmem:[%s4336_s1 + $0x6e4] ss:$16 sps:$4 sm:$0xff]  }
  0x63   :  { %1604 = vmatpush1.bf16.msra.mxu1 %v2960_v43  ;;  %v3052_v43 = vld [vmem:[%s4336_s1 + $0x2e8] ss:$16 sps:$4 sm:$0xff]  }
  0x64   :  { %1522 = vmatpush1.bf16.msra.mxu0 %v2957_v42  ;;  %1605 = vmatprep.subr.bf16.mxu1 %v2968_v45  ;;  %v3049_v42 = vld [vmem:[%s4336_s1 + $0x6e0] ss:$16 sps:$4 sm:$0xff]   ;;  %v3857_v45 = vld [vmem:[%s4335_s0 + $0x18] ss:$0 sps:$4 sm:$0xff]  }
  0x65   :  { %1523 = vmatprep.subr.bf16.mxu0 %v2965_v44  ;;  %v3058_v44 = vld [vmem:[%s4336_s1 + $0x30c] ss:$16 sps:$4 sm:$0xff]  }
  0x67   :  { %1606 = vmatpush1.bf16.msra.mxu1 %v2966_v47  ;;  %v3061_v47 = vld [vmem:[%s4336_s1 + $0x32c] ss:$16 sps:$4 sm:$0xff]  }
  0x68   :  { %1524 = vmatpush1.bf16.msra.mxu0 %v2963_v46  ;;  %1607 = vmatprep.subr.bf16.mxu1 %v2974_v49  ;;  %v3056_v46 = vld [vmem:[%s4336_s1 + $0x308] ss:$16 sps:$4 sm:$0xff]   ;;  %v3154_v49 = vld [vmem:[%s4338_s3 + $0x4] ss:$8 sps:$4 sm:$0xff]  }
  0x69   :  { %1525 = vmatprep.subr.bf16.mxu0 %v2971_v48  ;;  %v3152_v48 = vld [vmem:[%s4338_s3] ss:$8 sps:$4 sm:$0xff]  }
  0x6b   :  { %1608 = vmatpush1.bf16.msra.mxu1 %v2972_v52  ;;  %v3157_v52 = vld [vmem:[%s4338_s3 + $0x14] ss:$8 sps:$4 sm:$0xff]  }
  0x6c   :  { %1526 = vmatpush1.bf16.msra.mxu0 %v2969_v50  ;;  %1609 = vmatprep.subr.bf16.mxu1 %v2980_v54  ;;  %v3059_v50 = vld [vmem:[%s4336_s1 + $0x328] ss:$16 sps:$4 sm:$0xff]  }
  0x6d   :  { %1527 = vmatprep.subr.bf16.mxu0 %v2977_v53  ;;  %v3064_v53 = vld [vmem:[%s4336_s1 + $0x34c] ss:$16 sps:$4 sm:$0xff]   ;;  %v3155_v54 = vld [vmem:[%s4338_s3 + $0x10] ss:$8 sps:$4 sm:$0xff]  }
  0x6f   :  { %1610 = vmatpush1.bf16.msra.mxu1 %v2978_v56  ;;  %v3062_v56 = vld [vmem:[%s4336_s1 + $0x348] ss:$16 sps:$4 sm:$0xff]  }
  0x70   :  { %1528 = vmatpush1.bf16.msra.mxu0 %v2975_v55  ;;  %1611 = vmatprep.subr.bf16.mxu1 %v2986_v58  ;;  %v3160_v55 = vld [vmem:[%s4338_s3 + $0x24] ss:$8 sps:$4 sm:$0xff]   ;;  %v3158_v58 = vld [vmem:[%s4338_s3 + $0x20] ss:$8 sps:$4 sm:$0xff]  }
  0x71   :  { %1529 = vmatprep.subr.bf16.mxu0 %v2983_v57  ;;  %v3067_v57 = vld [vmem:[%s4336_s1 + $0x36c] ss:$16 sps:$4 sm:$0xff]  }
  0x73   :  { %1612 = vmatpush1.bf16.msra.mxu1 %v2984_v60  ;;  %v3070_v60 = vld [vmem:[%s4336_s1 + $0x38c] ss:$16 sps:$4 sm:$0xff]  }
  0x74   :  { %1530 = vmatpush1.bf16.msra.mxu0 %v2981_v59  ;;  %1613 = vmatprep.subr.bf16.mxu1 %v2992_v62  ;;  %v3065_v59 = vld [vmem:[%s4336_s1 + $0x368] ss:$16 sps:$4 sm:$0xff]  }
  0x75   :  { %1531 = vmatprep.subr.bf16.mxu0 %v2989_v61  ;;  %v3163_v61 = vld [vmem:[%s4338_s3 + $0x34] ss:$8 sps:$4 sm:$0xff]   ;;  %v3161_v62 = vld [vmem:[%s4338_s3 + $0x30] ss:$8 sps:$4 sm:$0xff]  }
  0x77   :  { %1614 = vmatpush1.bf16.msra.mxu1 %v2990_v0  ;;  %v3068_v0 = vld [vmem:[%s4336_s1 + $0x388] ss:$16 sps:$4 sm:$0xff]  }
  0x78   :  { %1532 = vmatpush1.bf16.msra.mxu0 %v2987_v63  ;;  %1615 = vmatprep.subr.bf16.mxu1 %v2998_v2  ;;  %v3166_v63 = vld [vmem:[%s4338_s3 + $0x44] ss:$8 sps:$4 sm:$0xff]   ;;  %v3164_v2 = vld [vmem:[%s4338_s3 + $0x40] ss:$8 sps:$4 sm:$0xff]  }
  0x79   :  { %1533 = vmatprep.subr.bf16.mxu0 %v2995_v1  ;;  %v3073_v1 = vld [vmem:[%s4336_s1 + $0x3ac] ss:$16 sps:$4 sm:$0xff]  }
  0x7b   :  { %1616 = vmatpush1.bf16.msra.mxu1 %v2996_v4  ;;  %v3071_v4 = vld [vmem:[%s4336_s1 + $0x3a8] ss:$16 sps:$4 sm:$0xff]  }
  0x7c   :  { %1534 = vmatpush1.bf16.msra.mxu0 %v2993_v3  ;;  %1617 = vmatprep.subr.bf16.mxu1 %v3004_v8  ;;  %v3169_v3 = vld [vmem:[%s4338_s3 + $0x54] ss:$8 sps:$4 sm:$0xff]   ;;  %v3167_v8 = vld [vmem:[%s4338_s3 + $0x50] ss:$8 sps:$4 sm:$0xff]  }
  0x7d   :  { %1535 = vmatprep.subr.bf16.mxu0 %v3001_v5  ;;  %v3076_v5 = vld [vmem:[%s4336_s1 + $0x3cc] ss:$16 sps:$4 sm:$0xff]  }
  0x7f   :  { %1618 = vmatpush1.bf16.msra.mxu1 %v3002_v10  ;;  %v3074_v10 = vld [vmem:[%s4336_s1 + $0x3c8] ss:$16 sps:$4 sm:$0xff]  }
  0x80   :  { %1536 = vmatpush1.bf16.msra.mxu0 %v2999_v9  ;;  %1628 = vmatprep.subr.bf16.mxu1 %v3012_v12  ;;  %v3172_v9 = vld [vmem:[%s4338_s3 + $0x64] ss:$8 sps:$4 sm:$0xff]   ;;  %v3170_v12 = vld [vmem:[%s4338_s3 + $0x60] ss:$8 sps:$4 sm:$0xff]  }
  0x81   :  { %1546 = vmatprep.subr.bf16.mxu0 %v3009_v11  ;;  %v3079_v11 = vld [vmem:[%s4336_s1 + $0x3ec] ss:$16 sps:$4 sm:$0xff]  }
  0x82   :  { %1620 = vmatmul.mubr.bf16.vlgmr.msra.gmra.mrb[4].mxu1 %v3544_v6  ;;  %v3024_v6 = vld [vmem:[%s4336_s1 + $0x24c] ss:$16 sps:$4 sm:$0xff]  }
  0x83   :  { %1538 = vmatmul.mubr.bf16.vlgmr.msra.gmra.mrb[0].mxu0 %v3755_v13  ;;  %1629 = vmatpush1.bf16.msra.mxu1 %v3010_v15  ;;  %v3077_v15 = vld [vmem:[%s4336_s1 + $0x3e8] ss:$16 sps:$4 sm:$0xff]  }
  0x84   :  { %1547 = vmatpush1.bf16.msra.mxu0 %v3007_v14  ;;  %1630 = vmatprep.subr.bf16.mxu1 %v3018_v17  ;;  %v3175_v14 = vld [vmem:[%s4338_s3 + $0x74] ss:$8 sps:$4 sm:$0xff]   ;;  %v3173_v17 = vld [vmem:[%s4338_s3 + $0x70] ss:$8 sps:$4 sm:$0xff]  }
  0x85   :  { %1548 = vmatprep.subr.bf16.mxu0 %v3015_v16  ;;  %1578 = vmatprep.mubr.bf16.mxu0 %v3292_v21  ;;  %v3082_v16 = vld [vmem:[%s4336_s1 + $0x40c] ss:$16 sps:$4 sm:$0xff]  }
  0x86   :  { %1660 = vmatprep.mubr.bf16.mxu1 %v3486_v51  ;;  %v3030_v51 = vld [vmem:[%s4336_s1 + $0x26c] ss:$16 sps:$4 sm:$0xff]  }
  0x87   :  { %1631 = vmatpush1.bf16.msra.mxu1 %v3016_v19  ;;  %v3080_v19 = vld [vmem:[%s4336_s1 + $0x408] ss:$16 sps:$4 sm:$0xff]  }
  0x88   :  { %1549 = vmatpush1.bf16.msra.mxu0 %v3013_v18  ;;  %1632 = vmatprep.subr.bf16.mxu1 %v3024_v6  ;;  %v3178_v18 = vld [vmem:[%s4338_s3 + $0x84] ss:$8 sps:$4 sm:$0xff]  }
  0x89   :  { %1550 = vmatprep.subr.bf16.mxu0 %v3021_v20 }
  0x8b   :  { %1633 = vmatpush1.bf16.msra.mxu1 %v3022_v23 }
  0x8c   :  { %1551 = vmatpush1.bf16.msra.mxu0 %v3019_v22  ;;  %1634 = vmatprep.subr.bf16.mxu1 %v3030_v51 }
  0x8d   :  { %1552 = vmatprep.subr.bf16.mxu0 %v3027_v24 }
  0x8f   :  { %1635 = vmatpush1.bf16.msra.mxu1 %v3028_v26 }
  0x90   :  { %1553 = vmatpush1.bf16.msra.mxu0 %v3025_v25  ;;  %1636 = vmatprep.subr.bf16.mxu1 %v3036_v28 }
  0x91   :  { %1554 = vmatprep.subr.bf16.mxu0 %v3033_v27 }
  0x93   :  { %1637 = vmatpush1.bf16.msra.mxu1 %v3034_v30 }
  0x94   :  { %1555 = vmatpush1.bf16.msra.mxu0 %v3031_v29  ;;  %1638 = vmatprep.subr.bf16.mxu1 %v3042_v32 }
  0x95   :  { %1556 = vmatprep.subr.bf16.mxu0 %v3039_v31 }
  0x97   :  { %1639 = vmatpush1.bf16.msra.mxu1 %v3040_v35 }
  0x98   :  { %1557 = vmatpush1.bf16.msra.mxu0 %v3037_v33  ;;  %1640 = vmatprep.subr.bf16.mxu1 %v3048_v37 }
  0x99   :  { %1558 = vmatprep.subr.bf16.mxu0 %v3045_v36 }
  0x9b   :  { %1641 = vmatpush1.bf16.msra.mxu1 %v3046_v39 }
  0x9c   :  { %1559 = vmatpush1.bf16.msra.mxu0 %v3043_v38  ;;  %1642 = vmatprep.subr.bf16.mxu1 %v3054_v41 }
  0x9d   :  { %1560 = vmatprep.subr.bf16.mxu0 %v3051_v40 }
  0x9f   :  { %1643 = vmatpush1.bf16.msra.mxu1 %v3052_v43 }
  0xa0   :  { %1561 = vmatpush1.bf16.msra.mxu0 %v3049_v42  ;;  %1644 = vmatprep.subr.bf16.mxu1 %v3058_v44 }
  0xa1   :  { %2155 = vmatprep.subr.bf16.mxu0 %v3154_v49 }
  0xa3   :  { %1579 = vmatmul.mubr.bf16.vlgmr.msra.gmra.mrb[0].mxu0 %v3857_v45  ;;  %1645 = vmatpush1.bf16.msra.mxu1 %v3056_v46 }
  0xa4   :  { %1646 = vmatprep.subr.bf16.mxu1 %v3061_v47  ;;  %2156 = vmatpush1.bf16.msra.mxu0 %v3152_v48 }
  0xa5   :  { %2157 = vmatprep.subr.bf16.mxu0 %v3157_v52 }
  0xa7   :  { %1647 = vmatpush1.bf16.msra.mxu1 %v3059_v50 }
  0xa8   :  { %1648 = vmatprep.subr.bf16.mxu1 %v3064_v53  ;;  %2158 = vmatpush1.bf16.msra.mxu0 %v3155_v54 }
  0xa9   :  { %2159 = vmatprep.subr.bf16.mxu0 %v3160_v55 }
  0xab   :  { %1649 = vmatpush1.bf16.msra.mxu1 %v3062_v56 }
  0xac   :  { %1650 = vmatprep.subr.bf16.mxu1 %v3067_v57  ;;  %2160 = vmatpush1.bf16.msra.mxu0 %v3158_v58 }
  0xad   :  { %2161 = vmatprep.subr.bf16.mxu0 %v3163_v61 }
  0xaf   :  { %1651 = vmatpush1.bf16.msra.mxu1 %v3065_v59 }
  0xb0   :  { %1652 = vmatprep.subr.bf16.mxu1 %v3070_v60  ;;  %2162 = vmatpush1.bf16.msra.mxu0 %v3161_v62 }
  0xb1   :  { %2163 = vmatprep.subr.bf16.mxu0 %v3166_v63 }
  0xb3   :  { %1653 = vmatpush1.bf16.msra.mxu1 %v3068_v0 }
  0xb4   :  { %1654 = vmatprep.subr.bf16.mxu1 %v3073_v1  ;;  %2164 = vmatpush1.bf16.msra.mxu0 %v3164_v2 }
  0xb5   :  { %2165 = vmatprep.subr.bf16.mxu0 %v3169_v3 }
  0xb7   :  { %1655 = vmatpush1.bf16.msra.mxu1 %v3071_v4 }
  0xb8   :  { %1656 = vmatprep.subr.bf16.mxu1 %v3076_v5  ;;  %2166 = vmatpush1.bf16.msra.mxu0 %v3167_v8 }
  0xb9   :  { %2167 = vmatprep.subr.bf16.mxu0 %v3172_v9 }
  0xbb   :  { %1657 = vmatpush1.bf16.msra.mxu1 %v3074_v10 }
  0xbc   :  { %1658 = vmatprep.subr.bf16.mxu1 %v3079_v11  ;;  %2168 = vmatpush1.bf16.msra.mxu0 %v3170_v12 }
  0xbd   :  { %2169 = vmatprep.subr.bf16.mxu0 %v3175_v14 }
  0xbf   :  { %1659 = vmatpush1.bf16.msra.mxu1 %v3077_v15 }
  0xc0   :  { %12 = vsyncpa [#allocation3], 0  ;;  %1669 = vmatprep.subr.bf16.mxu1 %v3082_v16  ;;  %v3085_v20 = vld [vmem:[%s4336_s1 + $0x42c] ss:$16 sps:$4 sm:$0xff]   ;;  %2170 = vmatpush1.bf16.msra.mxu0 %v3173_v17  ;;  %v3176_v6 = vld [vmem:[%s4338_s3 + $0x80] ss:$8 sps:$4 sm:$0xff]  }
  0xc1   :  { %2171 = vmatprep.subr.bf16.mxu0 %v3178_v18  ;;  %v3181_v22 = vld [vmem:[%s4338_s3 + $0x94] ss:$8 sps:$4 sm:$0xff]   ;;  %v3083_v23 = vld [vmem:[%s4336_s1 + $0x428] ss:$16 sps:$4 sm:$0xff]   ;;  %v3184_v51 = vld [vmem:[%s4338_s3 + $0xa4] ss:$8 sps:$4 sm:$0xff]  }
  0xc2   :  { %1661 = vmatmul.mubr.bf16.vlgmr.msra.gmra.mrb[4].mxu1 %v3546_v7  ;;  %v3088_v24 = vld [vmem:[%s4336_s1 + $0x44c] ss:$16 sps:$4 sm:$0xff]   ;;  %v3179_v7 = vld [vmem:[%s4338_s3 + $0x90] ss:$8 sps:$4 sm:$0xff]   ;;  %v3182_v26 = vld [vmem:[%s4338_s3 + $0xa0] ss:$8 sps:$4 sm:$0xff]  }
  0xc3   :  { %1670 = vmatpush1.bf16.msra.mxu1 %v3080_v19  ;;  %1701 = vmatprep.mubr.bf16.mxu1 %v3633_v34  ;;  %v3086_v34 = vld [vmem:[%s4336_s1 + $0x448] ss:$16 sps:$4 sm:$0xff]   ;;  %v3091_v25 = vld [vmem:[%s4336_s1 + $0x46c] ss:$16 sps:$4 sm:$0xff]   ;;  %s3293_s25 = smov [#allocation2]  }
  0xc4   :  { %1671 = vmatprep.subr.bf16.mxu1 %v3085_v20  ;;  %2172 = vmatpush1.bf16.msra.mxu0 %v3176_v6  ;;  %v3187_v27 = vld [vmem:[%s4338_s3 + $0xb4] ss:$8 sps:$4 sm:$0xff]   ;;  %v3089_v28 = vld [vmem:[%s4336_s1 + $0x468] ss:$16 sps:$4 sm:$0xff]   ;;  %v3190_v31 = vld [vmem:[%s4338_s3 + $0xc4] ss:$8 sps:$4 sm:$0xff]  }
  0xc5   :  { %2173 = vmatprep.subr.bf16.mxu0 %v3181_v22  ;;  %v3094_v29 = vld [vmem:[%s4336_s1 + $0x48c] ss:$16 sps:$4 sm:$0xff]   ;;  %v3185_v30 = vld [vmem:[%s4338_s3 + $0xb0] ss:$8 sps:$4 sm:$0xff]   ;;  %v3188_v35 = vld [vmem:[%s4338_s3 + $0xc0] ss:$8 sps:$4 sm:$0xff]  }
  0xc6   :  { %v3092_v32 = vld [vmem:[%s4336_s1 + $0x488] ss:$16 sps:$4 sm:$0xff]   ;;  %v3097_v33 = vld [vmem:[%s4336_s1 + $0x4ac] ss:$16 sps:$4 sm:$0xff]   ;;  %s2433_s26 = sshll.u32 %s3293_s25, 4  ;;  %s2434_s26 = int_to_ptr.vmem [resolvable:$true] %s2433_s26 }
  0xc7   :  { %1672 = vmatpush1.bf16.msra.mxu1 %v3083_v23  ;;  %v3193_v36 = vld [vmem:[%s4338_s3 + $0xd4] ss:$8 sps:$4 sm:$0xff]   ;;  %v3095_v37 = vld [vmem:[%s4336_s1 + $0x4a8] ss:$16 sps:$4 sm:$0xff]   ;;  %v3196_v58 = vld [vmem:[%s4338_s3 + $0xe4] ss:$8 sps:$4 sm:$0xff]   ;;  %v258_v23 = vlaneseq  ;;  %p3273_p1 = scmp.lt.s32.totalorder %s2434_s26, %s2434_s26 }
  0xc8   :  { %1673 = vmatprep.subr.bf16.mxu1 %v3088_v24  ;;  %2174 = vmatpush1.bf16.msra.mxu0 %v3179_v7  ;;  %v3100_v38 = vld [vmem:[%s4336_s1 + $0x4cc] ss:$16 sps:$4 sm:$0xff]   ;;  %v3191_v39 = vld [vmem:[%s4338_s3 + $0xd0] ss:$8 sps:$4 sm:$0xff]   ;;  %v3194_v59 = vld [vmem:[%s4338_s3 + $0xe0] ss:$8 sps:$4 sm:$0xff]  }
  0xc9   :  { %2175 = vmatprep.subr.bf16.mxu0 %v3184_v51  ;;  %v3098_v40 = vld [vmem:[%s4336_s1 + $0x4c8] ss:$16 sps:$4 sm:$0xff]   ;;  %v3103_v41 = vld [vmem:[%s4336_s1 + $0x4ec] ss:$16 sps:$4 sm:$0xff]   ;;  %v4153_v24 = vshrl.u32 %v258_v23, 7 }
  0xca   :  { %v3101_v42 = vld [vmem:[%s4336_s1 + $0x4e8] ss:$16 sps:$4 sm:$0xff]   ;;  %v3106_v43 = vld [vmem:[%s4336_s1 + $0x50c] ss:$16 sps:$4 sm:$0xff]   ;;  %v4159_v51 = vld [vmem:[%s4337_s2] sm:$0xf] }
  0xcb   :  { %1674 = vmatpush1.bf16.msra.mxu1 %v3086_v34  ;;  %v3104_v44 = vld [vmem:[%s4336_s1 + $0x508] ss:$16 sps:$4 sm:$0xff]   ;;  %v3109_v46 = vld [vmem:[%s4336_s1 + $0x52c] ss:$16 sps:$4 sm:$0xff]   ;;  %v260_v7 = vsub.s32 0, %v4153_v24  ;;  %v264_v34 = vsub.s32 1, %v4153_v24 }
  0xcc   :  { %1675 = vmatprep.subr.bf16.mxu1 %v3091_v25  ;;  %2176 = vmatpush1.bf16.msra.mxu0 %v3182_v26  ;;  %v3107_v47 = vld [vmem:[%s4336_s1 + $0x528] ss:$16 sps:$4 sm:$0xff]   ;;  %v3112_v48 = vld [vmem:[%s4336_s1 + $0x54c] ss:$16 sps:$4 sm:$0xff]  }
  0xcd   :  { %2177 = vmatprep.subr.bf16.mxu0 %v3187_v27  ;;  %v3110_v49 = vld [vmem:[%s4336_s1 + $0x548] ss:$16 sps:$4 sm:$0xff]   ;;  %v3115_v50 = vld [vmem:[%s4336_s1 + $0x56c] ss:$16 sps:$4 sm:$0xff]   ;;  %v261_v25 = vrot.slane %v4159_v51, %v260_v7 }
  0xce   :  { %v3113_v52 = vld [vmem:[%s4336_s1 + $0x568] ss:$16 sps:$4 sm:$0xff]   ;;  %v3118_v53 = vld [vmem:[%s4336_s1 + $0x58c] ss:$16 sps:$4 sm:$0xff]  }
  0xcf   :  { %1676 = vmatpush1.bf16.msra.mxu1 %v3089_v28  ;;  %v3116_v54 = vld [vmem:[%s4336_s1 + $0x588] ss:$16 sps:$4 sm:$0xff]   ;;  %v3121_v55 = vld [vmem:[%s4336_s1 + $0x5ac] ss:$16 sps:$4 sm:$0xff]  }
  0xd0   :  { %1677 = vmatprep.subr.bf16.mxu1 %v3094_v29  ;;  %2178 = vmatpush1.bf16.msra.mxu0 %v3185_v30  ;;  %v3119_v56 = vld [vmem:[%s4336_s1 + $0x5a8] ss:$16 sps:$4 sm:$0xff]   ;;  %v3124_v57 = vld [vmem:[%s4336_s1 + $0x5cc] ss:$16 sps:$4 sm:$0xff]  }
  0xd1   :  { %2179 = vmatprep.subr.bf16.mxu0 %v3190_v31  ;;  %v3122_v60 = vld [vmem:[%s4336_s1 + $0x5c8] ss:$16 sps:$4 sm:$0xff]   ;;  %v3127_v61 = vld [vmem:[%s4336_s1 + $0x5ec] ss:$16 sps:$4 sm:$0xff]  }
  0xd2   :  { %v3199_v62 = vld [vmem:[%s4338_s3 + $0xf4] ss:$8 sps:$4 sm:$0xff]   ;;  %v3197_v63 = vld [vmem:[%s4338_s3 + $0xf0] ss:$8 sps:$4 sm:$0xff]   ;;  %v3202_v2 = vld [vmem:[%s4338_s3 + $0x104] ss:$8 sps:$4 sm:$0xff]  }
  0xd3   :  { %1678 = vmatpush1.bf16.msra.mxu1 %v3092_v32  ;;  %v3125_v0 = vld [vmem:[%s4336_s1 + $0x5e8] ss:$16 sps:$4 sm:$0xff]   ;;  %v3130_v1 = vld [vmem:[%s4336_s1 + $0x60c] ss:$16 sps:$4 sm:$0xff]  }
  0xd4   :  { %1679 = vmatprep.subr.bf16.mxu1 %v3097_v33  ;;  %2180 = vmatpush1.bf16.msra.mxu0 %v3188_v35  ;;  %v3128_v3 = vld [vmem:[%s4336_s1 + $0x608] ss:$16 sps:$4 sm:$0xff]   ;;  %v3133_v4 = vld [vmem:[%s4336_s1 + $0x62c] ss:$16 sps:$4 sm:$0xff]  }
  0xd5   :  { %2181 = vmatprep.subr.bf16.mxu0 %v3193_v36  ;;  %v3131_v5 = vld [vmem:[%s4336_s1 + $0x628] ss:$16 sps:$4 sm:$0xff]   ;;  %v3136_v8 = vld [vmem:[%s4336_s1 + $0x64c] ss:$16 sps:$4 sm:$0xff]  }
  0xd6   :  { %v3134_v9 = vld [vmem:[%s4336_s1 + $0x648] ss:$16 sps:$4 sm:$0xff]   ;;  %v3142_v10 = vld [vmem:[%s4336_s1 + $0x68c] ss:$16 sps:$4 sm:$0xff]  }
  0xd7   :  { %1680 = vmatpush1.bf16.msra.mxu1 %v3095_v37  ;;  %v3140_v11 = vld [vmem:[%s4336_s1 + $0x688] ss:$16 sps:$4 sm:$0xff]   ;;  %v3145_v12 = vld [vmem:[%s4336_s1 + $0x6ac] ss:$16 sps:$4 sm:$0xff]  }
  0xd8   :  { %1681 = vmatprep.subr.bf16.mxu1 %v3100_v38  ;;  %2182 = vmatpush1.bf16.msra.mxu0 %v3191_v39  ;;  %v3143_v14 = vld [vmem:[%s4336_s1 + $0x6a8] ss:$16 sps:$4 sm:$0xff]   ;;  %v3148_v15 = vld [vmem:[%s4336_s1 + $0x6cc] ss:$16 sps:$4 sm:$0xff]  }
  0xd9   :  { %2183 = vmatprep.subr.bf16.mxu0 %v3196_v58  ;;  %v3146_v19 = vld [vmem:[%s4336_s1 + $0x6c8] ss:$16 sps:$4 sm:$0xff]   ;;  %v3151_v6 = vld [vmem:[%s4336_s1 + $0x6ec] ss:$16 sps:$4 sm:$0xff]  }
  0xda   :  { %v3149_v22 = vld [vmem:[%s4336_s1 + $0x6e8] ss:$16 sps:$4 sm:$0xff]  }
  0xdb   :  { %1682 = vmatpush1.bf16.msra.mxu1 %v3098_v40  ;;  %v3200_v38 = vld [vmem:[%s4338_s3 + $0x100] ss:$8 sps:$4 sm:$0xff]   ;;  %v3205_v40 = vld [vmem:[%s4338_s3 + $0x114] ss:$8 sps:$4 sm:$0xff]  }
  0xdc   :  { %1683 = vmatprep.subr.bf16.mxu1 %v3103_v41  ;;  %2184 = vmatpush1.bf16.msra.mxu0 %v3194_v59  ;;  %v3248_v41 = vld [vmem:[%s4340_s5 + $0x40] sm:$0xff]   ;;  %v3217_v59 = vld [vmem:[%s4338_s3 + $0x154] ss:$8 sps:$4 sm:$0xff]  }
  0xdd   :  { %2185 = vmatprep.subr.bf16.mxu0 %v3199_v62  ;;  %v3212_v58 = vld [vmem:[%s4338_s3 + $0x140] ss:$8 sps:$4 sm:$0xff]   ;;  %v3215_v62 = vld [vmem:[%s4338_s3 + $0x150] ss:$8 sps:$4 sm:$0xff]  }
  0xdf   :  { %1684 = vmatpush1.bf16.msra.mxu1 %v3101_v42  ;;  %v3249_v42 = vld [vmem:[%s4340_s5] sm:$0xff]  }
  0xe0   :  { %1685 = vmatprep.subr.bf16.mxu1 %v3106_v43  ;;  %2186 = vmatpush1.bf16.msra.mxu0 %v3197_v63  ;;  %v3250_v43 = vld [vmem:[%s4340_s5 + $0x48] sm:$0xff]  }
  0xe1   :  { %2196 = vmatprep.subr.bf16.mxu0 %v3202_v2  ;;  %v3220_v63 = vld [vmem:[%s4338_s3 + $0x164] ss:$8 sps:$4 sm:$0xff]   ;;  %v3223_v2 = vld [vmem:[%s4338_s3 + $0x174] ss:$8 sps:$4 sm:$0xff]  }
  0xe3   :  { %1686 = vmatpush1.bf16.msra.mxu1 %v3104_v44  ;;  %v3203_v44 = vld [vmem:[%s4338_s3 + $0x110] ss:$8 sps:$4 sm:$0xff]  }
  0xe4   :  { %1687 = vmatprep.subr.bf16.mxu1 %v3109_v46  ;;  %v3208_v46 = vld [vmem:[%s4338_s3 + $0x124] ss:$8 sps:$4 sm:$0xff]  }
  0xe7   :  { %1688 = vmatpush1.bf16.msra.mxu1 %v3107_v47  ;;  %v3251_v47 = vld [vmem:[%s4340_s5 + $0x8] sm:$0xff]  }
  0xe8   :  { %1689 = vmatprep.subr.bf16.mxu1 %v3112_v48  ;;  %v3252_v48 = vld [vmem:[%s4340_s5 + $0x50] sm:$0xff]  }
  0xeb   :  { %1690 = vmatpush1.bf16.msra.mxu1 %v3110_v49  ;;  %v3206_v49 = vld [vmem:[%s4338_s3 + $0x120] ss:$8 sps:$4 sm:$0xff]  }
  0xec   :  { %1691 = vmatprep.subr.bf16.mxu1 %v3115_v50  ;;  %v3211_v50 = vld [vmem:[%s4338_s3 + $0x134] ss:$8 sps:$4 sm:$0xff]  }
  0xef   :  { %1692 = vmatpush1.bf16.msra.mxu1 %v3113_v52  ;;  %v3253_v52 = vld [vmem:[%s4340_s5 + $0x10] sm:$0xff]  }
  0xf0   :  { %1693 = vmatprep.subr.bf16.mxu1 %v3118_v53  ;;  %v3254_v53 = vld [vmem:[%s4340_s5 + $0x58] sm:$0xff]  }
  0xf3   :  { %1694 = vmatpush1.bf16.msra.mxu1 %v3116_v54  ;;  %v3209_v54 = vld [vmem:[%s4338_s3 + $0x130] ss:$8 sps:$4 sm:$0xff]  }
  0xf4   :  { %1695 = vmatprep.subr.bf16.mxu1 %v3121_v55  ;;  %v3214_v55 = vld [vmem:[%s4338_s3 + $0x144] ss:$8 sps:$4 sm:$0xff]  }
  0xf7   :  { %1696 = vmatpush1.bf16.msra.mxu1 %v3119_v56  ;;  %v3255_v56 = vld [vmem:[%s4340_s5 + $0x18] sm:$0xff]  }
  0xf8   :  { %1697 = vmatprep.subr.bf16.mxu1 %v3124_v57  ;;  %v3256_v57 = vld [vmem:[%s4340_s5 + $0x60] sm:$0xff]  }
  0xfb   :  { %1698 = vmatpush1.bf16.msra.mxu1 %v3122_v60  ;;  %v3257_v60 = vld [vmem:[%s4340_s5 + $0x20] sm:$0xff]  }
  0xfc   :  { %1699 = vmatprep.subr.bf16.mxu1 %v3127_v61  ;;  %v3258_v61 = vld [vmem:[%s4340_s5 + $0x68] sm:$0xff]  }
  0xff   :  { %1700 = vmatpush1.bf16.msra.mxu1 %v3125_v0  ;;  %v3259_v0 = vld [vmem:[%s4340_s5 + $0x28] sm:$0xff]  }
 0x100   :  { %1710 = vmatprep.subr.bf16.mxu1 %v3130_v1  ;;  %v3218_v1 = vld [vmem:[%s4338_s3 + $0x160] ss:$8 sps:$4 sm:$0xff]  }
 0x102   :  { %1702 = vmatmul.mubr.bf16.vlgmr.msra.gmra.mrb[4].mxu1 %v3755_v13  ;;  %v3139_v13 = vld [vmem:[%s4336_s1 + $0x66c] ss:$16 sps:$4 sm:$0xff]  }
 0x103   :  { %1711 = vmatpush1.bf16.msra.mxu1 %v3128_v3  ;;  %1742 = vmatprep.mubr.bf16.mxu1 %v3292_v21  ;;  %v3137_v21 = vld [vmem:[%s4336_s1 + $0x668] ss:$16 sps:$4 sm:$0xff]  }
 0x104   :  { %1712 = vmatprep.subr.bf16.mxu1 %v3133_v4  ;;  %v3221_v3 = vld [vmem:[%s4338_s3 + $0x170] ss:$8 sps:$4 sm:$0xff]   ;;  %v3226_v4 = vld [vmem:[%s4338_s3 + $0x184] ss:$8 sps:$4 sm:$0xff]  }
 0x107   :  { %1713 = vmatpush1.bf16.msra.mxu1 %v3131_v5  ;;  %v3224_v5 = vld [vmem:[%s4338_s3 + $0x180] ss:$8 sps:$4 sm:$0xff]  }
 0x108   :  { %1714 = vmatprep.subr.bf16.mxu1 %v3136_v8  ;;  %v3229_v8 = vld [vmem:[%s4338_s3 + $0x194] ss:$8 sps:$4 sm:$0xff]  }
 0x10b   :  { %1715 = vmatpush1.bf16.msra.mxu1 %v3134_v9  ;;  %v3227_v9 = vld [vmem:[%s4338_s3 + $0x190] ss:$8 sps:$4 sm:$0xff]  }
 0x10c   :  { %1716 = vmatprep.subr.bf16.mxu1 %v3139_v13  ;;  %v3232_v13 = vld [vmem:[%s4338_s3 + $0x1a4] ss:$8 sps:$4 sm:$0xff]  }
 0x10f   :  { %1717 = vmatpush1.bf16.msra.mxu1 %v3137_v21  ;;  %v3230_v21 = vld [vmem:[%s4338_s3 + $0x1a0] ss:$8 sps:$4 sm:$0xff]  }
 0x110   :  { %1718 = vmatprep.subr.bf16.mxu1 %v3142_v10  ;;  %v3235_v10 = vld [vmem:[%s4338_s3 + $0x1b4] ss:$8 sps:$4 sm:$0xff]  }
 0x113   :  { %1719 = vmatpush1.bf16.msra.mxu1 %v3140_v11  ;;  %v3233_v11 = vld [vmem:[%s4338_s3 + $0x1b0] ss:$8 sps:$4 sm:$0xff]  }
 0x114   :  { %1720 = vmatprep.subr.bf16.mxu1 %v3145_v12  ;;  %v3238_v12 = vld [vmem:[%s4338_s3 + $0x1c4] ss:$8 sps:$4 sm:$0xff]  }
 0x115   :  { %v1457_v16 = vpop.f32.mrb[0].mxu1 }
 0x116   :  { %v1459_v17 = vpop.f32.mrb[1].mxu1  ;;  %v1458_v26 = vadd.f32 %v1457_v16, %v261_v25  ;;  %v3239_v16 = vld [vmem:[%s4338_s3 + $0x1d0] ss:$8 sps:$4 sm:$0xff]  }
 0x117   :  { %v1461_v18 = vpop.f32.mrb[2].mxu1  ;;  %1721 = vmatpush1.bf16.msra.mxu1 %v3143_v14  ;;  %v3236_v14 = vld [vmem:[%s4338_s3 + $0x1c0] ss:$8 sps:$4 sm:$0xff]  }
 0x118   :  { %v1462_v20 = vpop.f32.mrb[3].mxu1  ;;  %1722 = vmatprep.subr.bf16.mxu1 %v3148_v15  ;;  %v3241_v15 = vld [vmem:[%s4338_s3 + $0x1d4] ss:$8 sps:$4 sm:$0xff]   ;;  %v3242_v18 = vld [vmem:[%s4338_s3 + $0x1e0] ss:$8 sps:$4 sm:$0xff]  }
 0x119   :  { %v3245_v20 = vld [vmem:[%s4338_s3 + $0x1f0] ss:$8 sps:$4 sm:$0xff]  }
 0x11b   :  { %1723 = vmatpush1.bf16.msra.mxu1 %v3146_v19  ;;  %v3247_v19 = vld [vmem:[%s4338_s3 + $0x1f4] ss:$8 sps:$4 sm:$0xff]  }
 0x11c   :  { %1724 = vmatprep.subr.bf16.mxu1 %v3151_v6  ;;  %v268_v6 = vsub.s32 2, %v4153_v24 }
 0x11e   :  { %v269_v23 = vrot.slane %v4159_v51, %v268_v6 }
 0x11f   :  { %1725 = vmatpush1.bf16.msra.mxu1 %v3149_v22  ;;  %v272_v22 = vsub.s32 3, %v4153_v24 }
 0x120   :  { %2753 = vmatprep.subr.bf16.mxu1 %v3248_v41 }
 0x121   :  { %v273_v25 = vrot.slane %v4159_v51, %v272_v22 }
 0x122   :  { %1743 = vmatmul.mubr.bf16.vlgmr.msra.gmra.mrb[4].mxu1 %v3857_v45  ;;  %v265_v45 = vrot.slane %v4159_v51, %v264_v34  ;;  %v3261_v51 = vld [vmem:[%s4340_s5 + $0x30] sm:$0xff]  }
 0x123   :  { %2754 = vmatpush3.bf16.msra.mxu1 %v3249_v42 }
 0x124   :  { %v1460_v27 = vadd.f32 %v1459_v17, %v265_v45  ;;  %2755 = vmatprep.subr.bf16.mxu1 %v3250_v43  ;;  %v3244_v17 = vld [vmem:[%s4338_s3 + $0x1e4] ss:$8 sps:$4 sm:$0xff]  }
 0x127   :  { %2756 = vmatpush3.bf16.msra.mxu1 %v3251_v47 }
 0x128   :  { %2757 = vmatprep.subr.bf16.mxu1 %v3252_v48 }
 0x12b   :  { %2758 = vmatpush3.bf16.msra.mxu1 %v3253_v52 }
 0x12c   :  { %2759 = vmatprep.subr.bf16.mxu1 %v3254_v53 }
 0x12f   :  { %2760 = vmatpush3.bf16.msra.mxu1 %v3255_v56 }
 0x130   :  { %2761 = vmatprep.subr.bf16.mxu1 %v3256_v57 }
 0x133   :  { %2762 = vmatpush3.bf16.msra.mxu1 %v3257_v60 }
 0x134   :  { %2763 = vmatprep.subr.bf16.mxu1 %v3258_v61 }
 0x137   :  { %2764 = vmatpush3.bf16.msra.mxu1 %v3259_v0 }
 0x176   :  { %v1580_v28 = vpop.f32.mrb[0].mxu0 }
 0x177   :  { %v2776_v29 = vadd.f32 %v1580_v28, %v1458_v26  ;;  %v1582_v30 = vpop.f32.mrb[1].mxu0 }
 0x178   :  { %v2778_v31 = vadd.f32 %v1582_v30, %v1460_v27  ;;  %v1584_v32 = vpop.f32.mrb[2].mxu0 }
 0x179   :  { %v1751_v33 = vmax.f32 %v2776_v29, 0.0  ;;  %v1585_v35 = vpop.f32.mrb[3].mxu0 }
 0x17a   :  { %v1752_v36 = vmax.f32 %v2778_v31, 0.0 }
 0x17b   :  { %v1755_v39 = vpack.c.bf16 %v1751_v33, %v1751_v33 }
 0x17c   :  { %v1756_v37 = vpack.c.bf16 %v1752_v36, %v1752_v36  ;;  %v3260_v36 = vld [vmem:[%s4340_s5 + $0x70] sm:$0xff]  }
 0x17d   :  { %2765 = vmatprep.subr.bf16.mxu1 %v3260_v36 }
 0x17e   :  { %2187 = vmatprep.mubr.bf16.mxu0 %v1756_v37  ;;  %2766 = vmatpush3.bf16.msra.mxu1 %v3261_v51  ;;  %v3262_v37 = vld [vmem:[%s4340_s5 + $0x78] sm:$0xff]  }
 0x17f   :  { %2188 = vmatmul.mubr.bf16.vlgmr.msra.gmra.mrb[4].mxu0 %v1755_v39  ;;  %2767 = vmatprep.subr.bf16.mxu1 %v3262_v37  ;;  %v1823_v39 = vld [vmem:[%s4339_s4] sm:$0x3] }
 0x180   :  { %2197 = vmatpush1.bf16.msra.mxu0 %v3200_v38  ;;  %v3263_v38 = vld [vmem:[%s4340_s5 + $0x38] sm:$0xff]   ;;  %v1832_v41 = vrot.slane %v1823_v39, %v264_v34 }
 0x181   :  { %2198 = vmatprep.subr.bf16.mxu0 %v3205_v40  ;;  %v1828_v40 = vrot.slane %v1823_v39, %v260_v7  ;;  %v2736_v7 = vld [vmem:[%s4341_s6] ss:$0 sm:$0xff]  ;;  %s3268_s6 = scalar_lea.vmem %s2434_s26, 128 }
 0x182   :  { %2768 = vmatpush3.bf16.msra.mxu1 %v3263_v38  ;;  %p3269_p0 = scmp.ne.s32.totalorder %s2434_s26, %s3268_s6  ;;  %p3274_p2 = scmp.lt.s32.totalorder %s3268_s6, %s3268_s6 }
 0x184   :  { %2199 = vmatpush1.bf16.msra.mxu0 %v3203_v44  ;;  %p3275_p3 = por %p3274_p2, %p3273_p1 }
 0x185   :  { %2200 = vmatprep.subr.bf16.mxu0 %v3208_v46 }
 0x186   :  { %p3276_p4 = pnand %p3275_p3, %p3269_p0 }
 0x188   :  { %2201 = vmatpush1.bf16.msra.mxu0 %v3206_v49 }
 0x189   :  { %2202 = vmatprep.subr.bf16.mxu0 %v3211_v50 }
 0x18c   :  { %2203 = vmatpush1.bf16.msra.mxu0 %v3209_v54 }
 0x18d   :  { %2204 = vmatprep.subr.bf16.mxu0 %v3214_v55 }
 0x190   :  { %2205 = vmatpush1.bf16.msra.mxu0 %v3212_v58 }
 0x191   :  { %2206 = vmatprep.subr.bf16.mxu0 %v3217_v59 }
 0x194   :  { %2207 = vmatpush1.bf16.msra.mxu0 %v3215_v62 }
 0x195   :  { %2208 = vmatprep.subr.bf16.mxu0 %v3220_v63 }
 0x198   :  { %2209 = vmatpush1.bf16.msra.mxu0 %v3218_v1 }
 0x199   :  { %2210 = vmatprep.subr.bf16.mxu0 %v3223_v2 }
 0x19c   :  { %2211 = vmatpush1.bf16.msra.mxu0 %v3221_v3 }
 0x19d   :  { %2212 = vmatprep.subr.bf16.mxu0 %v3226_v4 }
 0x1a0   :  { %2213 = vmatpush1.bf16.msra.mxu0 %v3224_v5 }
 0x1a1   :  { %2214 = vmatprep.subr.bf16.mxu0 %v3229_v8 }
 0x1a4   :  { %2215 = vmatpush1.bf16.msra.mxu0 %v3227_v9 }
 0x1a5   :  { %2216 = vmatprep.subr.bf16.mxu0 %v3232_v13 }
 0x1a8   :  { %2217 = vmatpush1.bf16.msra.mxu0 %v3230_v21 }
 0x1a9   :  { %2218 = vmatprep.subr.bf16.mxu0 %v3235_v10 }
 0x1ac   :  { %2219 = vmatpush1.bf16.msra.mxu0 %v3233_v11 }
 0x1ad   :  { %2220 = vmatprep.subr.bf16.mxu0 %v3238_v12 }
 0x1b0   :  { %2221 = vmatpush1.bf16.msra.mxu0 %v3236_v14 }
 0x1b1   :  { %2222 = vmatprep.subr.bf16.mxu0 %v3241_v15 }
 0x1b4   :  { %2223 = vmatpush1.bf16.msra.mxu0 %v3239_v16 }
 0x1b5   :  { %2224 = vmatprep.subr.bf16.mxu0 %v3244_v17 }
 0x1b8   :  { %2225 = vmatpush1.bf16.msra.mxu0 %v3242_v18 }
 0x1b9   :  { %2226 = vmatprep.subr.bf16.mxu0 %v3247_v19 }
 0x1bc   :  { %2227 = vmatpush1.bf16.msra.mxu0 %v3245_v20 }
 0x1f5   :  { %v1744_v45 = vpop.f32.mrb[4].mxu1 }
 0x1f6   :  { %v2779_v26 = vadd.f32 %v1744_v45, %v269_v23  ;;  %v1746_v27 = vpop.f32.mrb[5].mxu1 }
 0x1f7   :  { %v2780_v28 = vadd.f32 %v1746_v27, %v273_v25  ;;  %v1748_v29 = vpop.f32.mrb[6].mxu1 }
 0x1f8   :  { %v1753_v30 = vmax.f32 %v2779_v26, 0.0  ;;  %v1749_v31 = vpop.f32.mrb[7].mxu1 }
 0x1f9   :  { %v1754_v32 = vmax.f32 %v2780_v28, 0.0 }
 0x1fa   :  { %v1757_v35 = vpack.c.bf16 %v1753_v30, %v1753_v30 }
 0x1fb   :  { %v1758_v33 = vpack.c.bf16 %v1754_v32, %v1754_v32 }
 0x1fd   :  { %2228 = vmatprep.mubr.bf16.mxu0 %v1758_v33 }
 0x1fe   :  { %2229 = vmatmul.mubr.bf16.vlgmr.msra.gmra.mrb[4].mxu0 %v1757_v35 }
 0x2d1   :  { %v2230_v42 = vpop.f32.mrb[4].mxu0 }
 0x2d2   :  { %v2781_v43 = vadd.f32 %v2230_v42, %v1828_v40  ;;  %v2232_v44 = vpop.f32.mrb[5].mxu0 }
 0x2d3   :  { %v2782_v46 = vadd.f32 %v2232_v44, %v1832_v41  ;;  %v2234_v47 = vpop.f32.mrb[6].mxu0 }
 0x2d4   :  { %v2237_v48 = vmax.f32 %v2781_v43, 0.0  ;;  %v2235_v49 = vpop.f32.mrb[7].mxu0 }
 0x2d5   :  { %v2238_v50 = vmax.f32 %v2782_v46, 0.0 }
 0x2d6   :  { %v2239_v53 = vpack.c.bf16 %v2237_v48, %v2237_v48 }
 0x2d7   :  { %v2240_v52 = vpack.c.bf16 %v2238_v50, %v2238_v50 }
 0x2d9   :  { %2408 = vmatprep.mubr.bf16.mxu1 %v2240_v52 }
 0x2da   :  { %2409 = vmatmul.mubr.bf16.vlgmr.msra.gmra.mrb[8].mxu1 %v2239_v53 }
 0x3ad   :  { %v2769_v54 = vpop.f32.mrb[8].mxu1 }
 0x3ae   :  { %v2770_v55 = vpop.f32.mrb[9].mxu1 }
 0x3af   :  { %v2771_v24 = vadd.f32 %v2770_v55, %v2769_v54  ;;  %v2772_v34 = vpop.f32.mrb[10].mxu1 }
 0x3b0   :  { %v2773_v56 = vpop.f32.mrb[11].mxu1 }
 0x3b1   :  { %v2411_v57 = vadd.f32 %v2771_v24, %v2736_v7 }
 0x3b3   :  { %2416 = vmax.xlane.f32.xlu0 %v2411_v57 }
 0x440   :  { %v2417_v58 = vpop.xlane.xlu0 %2416 }
 0x441   :  { %v2418_v59 = vsub.f32 %v2411_v57, %v2417_v58 }
 0x443   :  { %v2419_v60 = vmul.f32 1.442695, %v2418_v59 }
 0x445   :  { %3264 = vpow2.f32 %v2419_v60 }
 0x44f   :  { %v3265_v61 = vpop.eup %3264 }
 0x450   :  { %2421 = vadd.xlane.f32.xlu0 %v3265_v61 }
 0x4dd   :  { %v2422_v62 = vpop.xlane.xlu0 %2421 }
 0x4de   :  { %3266 = vlog2.f32 %v2422_v62 }
 0x4e8   :  { %v3267_v63 = vpop.eup %3266 }
 0x4e9   :  { %v2424_v0 = vmul.f32 0.6931472, %v3267_v63 }
 0x4eb   :  { %v2425_v1 = vsub.f32 %v2418_v59, %v2424_v0 }
 0x4ed   :  { %2426 = vst [vmem:[#allocation2] sm:$0xff] %v2425_v1 }
 0x4ee   :  { %3279 = shalt.err (!%p3276_p4)
}
 0x4ef   :  { %s3280_s29 = scalar_lea.hbm %s4342_s7, 128 }
 0x4f0   :  { %p3281_p5 = scmp.ne.s32.totalorder %s4342_s7, %s3280_s29  ;;  %p3284_p6 = scmp.lt.u32.totalorder %s3280_s29, %s4342_s7 }
 0x4f2   :  { %p3286_p7 = pnand %p3284_p6, %p3281_p5 }
 0x4f4   :  { %3289 = shalt.err (!%p3286_p7)
}
 0x4f5   :  { %2436 = dma.vmem_to_hbm [thread:$0]  %s2434_s26, 128, %s4342_s7, [#allocation3]  }
 0x4f6   :  { %3290 = dma.done.wait [#allocation3], 128  }
 0x4f7   :  { %3291 = vsyncadd [#allocation3], 4294967168 }
 0x4f8   :  { %2440 = vsyncpa [#allocation3], 1 }

</bundles_post_ra>
